<compile_context>
chip_gen: v5e
topology: v5e:2x2
jax: 0.10.0
libtpu: 0.0.40
codegen_flags: <defaults>
</compile_context>

<pallas_src>
import functools

import jax
import jax.numpy as jnp
from jax.experimental import pallas as pl
from jax.experimental.pallas import tpu as pltpu


_LANE = 128  # feature dims are padded to multiples of this (lane-dense layout)


def _round_up(n: int, m: int) -> int:
    return ((n + m - 1) // m) * m


# ----------------------------------------------------------------------------
# Pallas kernel: fused 2-layer MLP forward for one batch tile.
# Weights/biases use constant block indices so they stay VMEM-resident while
# the x / out tiles are software-pipelined across the batch grid.
# ----------------------------------------------------------------------------
def _mlp_kernel(x_ref, w1_ref, b1_ref, w2_ref, b2_ref, o_ref):
    # Cast streamed activations to the MXU dtype in-kernel (saves a separate
    # XLA cast pass over x and its extra HBM round trip; VPU has slack).
    x = x_ref[...].astype(w1_ref.dtype)                                # [TB, D_in]
    h = jnp.dot(x, w1_ref[...], preferred_element_type=jnp.float32)    # MXU, f32 acc
    h = h + b1_ref[...]                                                # f32 bias, no cast
    h = jnp.maximum(h, 0.0).astype(w2_ref.dtype)                       # ReLU -> MXU dtype
    o = jnp.dot(h, w2_ref[...], preferred_element_type=jnp.float32)    # MXU, f32 acc
    o = o + b2_ref[...]
    o_ref[...] = o.astype(o_ref.dtype)


@functools.partial(jax.jit, static_argnames=("tb", "out_dtype", "single_buffer_weights"))
def _mlp_forward_impl(x, w1, b1, w2, b2, *, tb, out_dtype, single_buffer_weights):
    """x: [B, D_in] in its native dtype. Weights already padded/lane-aligned."""
    B, D_in = x.shape
    H = w1.shape[1]
    D_out = w2.shape[1]

    # Shrink the tile for tiny batches (single grid point; sublane multiple of 8).
    tb_eff = min(tb, _round_up(B, 8))
    n_tiles = pl.cdiv(B, tb_eff)  # partial last tile handled by Pallas (no pad/slice copies)

    # Explicit VMEM budget: resident weights (+biases) + double-buffered x/out
    # tiles + f32 intermediates, with headroom. Clamped to [32 MiB, 64 MiB] so
    # it is safe on every generation (v7x has 64 MiB physical per TensorCore;
    # v5e's default scoped limit of 16 MiB is too small when tb grows).
    def _isz(a):
        return jnp.dtype(a.dtype).itemsize

    weight_bytes = (w1.size * _isz(w1) + w2.size * _isz(w2)
                    + b1.size * _isz(b1) + b2.size * _isz(b2))
    stream_bytes = 2 * tb_eff * (D_in * _isz(x) + D_out * jnp.dtype(out_dtype).itemsize)
    scratch_bytes = 2 * tb_eff * max(H, D_out) * 4
    vmem_limit = int(min(max(weight_bytes + stream_bytes + scratch_bytes + (8 << 20),
                             32 << 20), 64 << 20))

    if single_buffer_weights:
        # Constant-index blocks don't need double buffering -> halves weight VMEM.
        resident = dict(pipeline_mode=pl.Buffered(1))
    else:
        resident = {}

    return pl.pallas_call(
        _mlp_kernel,
        out_shape=jax.ShapeDtypeStruct((B, D_out), out_dtype),
        grid_spec=pltpu.PrefetchScalarGridSpec(
            num_scalar_prefetch=0,
            grid=(n_tiles,),
            in_specs=[
                pl.BlockSpec((tb_eff, D_in), lambda i: (i, 0)),          # streamed x tile
                pl.BlockSpec((D_in, H), lambda i: (0, 0), **resident),   # VMEM-resident w1
                pl.BlockSpec((1, H), lambda i: (0, 0), **resident),      # b1 (f32)
                pl.BlockSpec((H, D_out), lambda i: (0, 0), **resident),  # VMEM-resident w2
                pl.BlockSpec((1, D_out), lambda i: (0, 0), **resident),  # b2 (f32)
            ],
            out_specs=pl.BlockSpec((tb_eff, D_out), lambda i: (i, 0)),
        ),
        compiler_params=pltpu.CompilerParams(
            # Batch tiles are independent -> shard across TensorCores on v7x.
            dimension_semantics=("parallel",),
            vmem_limit_bytes=vmem_limit,
        ),
    )(x, w1, b1, w2, b2)


# Remember whether single-buffered (pl.Buffered(1)) weight specs compile on this
# jax/libtpu; fall back to default double buffering if not.
_SINGLE_BUFFER_WEIGHTS_OK = None


def _mlp_forward(x, w1, b1, w2, b2, *, tb=256, out_dtype=jnp.bfloat16):
    global _SINGLE_BUFFER_WEIGHTS_OK
    if _SINGLE_BUFFER_WEIGHTS_OK is not False:
        try:
            out = _mlp_forward_impl(x, w1, b1, w2, b2, tb=tb, out_dtype=out_dtype,
                                    single_buffer_weights=True)
            _SINGLE_BUFFER_WEIGHTS_OK = True
            return out
        except Exception:
            _SINGLE_BUFFER_WEIGHTS_OK = False
    return _mlp_forward_impl(x, w1, b1, w2, b2, tb=tb, out_dtype=out_dtype,
                             single_buffer_weights=False)


# ----------------------------------------------------------------------------
# ModuleWithStorage equivalent: flat shared byte storage + cached typed views
# ----------------------------------------------------------------------------
class ModuleWithStorage:
    """Holds all parameters of the inner MLP in one flat byte-storage buffer.

    Mirrors the PyTorch wrapper: __init__ packs every parameter of the inner
    module into a single contiguous (untyped, uint8) storage and materializes
    typed views of that storage; forward() delegates to the inner module's
    forward (fused Pallas MLP kernel).  Views are computed once at pack time.
    """

    # TODO(synk): torch.UntypedStorage's in-place `.data` re-pointing (mutable
    # aliasing) has no JAX equivalent (arrays are immutable); the flat byte
    # buffer + cached views reproduces the forward semantics only.  Note that
    # keeping both `storage` and the views alive doubles parameter HBM footprint.

    def __init__(self, d_in: int, d_hidden: int, d_out: int, key,
                 *, param_dtype=jnp.bfloat16, out_dtype=jnp.bfloat16,
                 batch_tile: int = 256):
        self.d_in, self.d_hidden, self.d_out = d_in, d_hidden, d_out
        self.param_dtype = param_dtype
        self.out_dtype = out_dtype
        self.batch_tile = batch_tile

        # Lane-aligned (padded) feature dims.
        self.d_in_p = _round_up(d_in, _LANE)
        self.d_hidden_p = _round_up(d_hidden, _LANE)
        self.d_out_p = _round_up(d_out, _LANE)

        k1, k2, k3, k4 = jax.random.split(key, 4)
        # Deterministic synthetic init; weight layout is [in, out] so the
        # kernel computes x @ w + b directly on the MXU.
        w1 = jax.random.normal(k1, (d_in, d_hidden), jnp.float32) * 0.1
        b1 = jax.random.normal(k2, (d_hidden,), jnp.float32) * 0.01
        w2 = jax.random.normal(k3, (d_hidden, d_out), jnp.float32) * 0.1
        b2 = jax.random.normal(k4, (d_out,), jnp.float32) * 0.01

        # Zero-pad to lane-aligned shapes (zeros are mathematically inert).
        w1p = jnp.zeros((self.d_in_p, self.d_hidden_p), jnp.float32).at[:d_in, :d_hidden].set(w1)
        b1p = jnp.zeros((1, self.d_hidden_p), jnp.float32).at[:, :d_hidden].set(b1)
        w2p = jnp.zeros((self.d_hidden_p, self.d_out_p), jnp.float32).at[:d_hidden, :d_out].set(w2)
        b2p = jnp.zeros((1, self.d_out_p), jnp.float32).at[:, :d_out].set(b2)

        # Weights in the MXU dtype (bf16); biases stay f32 (tiny; added to the
        # f32 accumulator in-kernel, so no per-grid-step cast/broadcast).
        params = [("w1", w1p.astype(param_dtype)),
                  ("b1", b1p),
                  ("w2", w2p.astype(param_dtype)),
                  ("b2", b2p)]

        # ---- flat shared byte storage (torch.UntypedStorage analogue) ----
        self.shapes, self.dtypes, self.offsets = {}, {}, {}
        byte_parts, off = [], 0
        for name, p in params:
            isz = jnp.dtype(p.dtype).itemsize
            nbytes = int(p.size) * isz
            self.shapes[name] = p.shape
            self.dtypes[name] = p.dtype
            self.offsets[name] = (off, off + nbytes)
            byte_parts.append(jax.lax.bitcast_convert_type(p, jnp.uint8).reshape(-1))
            off += nbytes
        self.storage = jnp.concatenate(byte_parts)  # one flat untyped buffer

        # Cache the typed views ONCE (pack time) — no per-call slice/bitcast copies.
        for name in self.shapes:
            start, end = self.offsets[name]
            shape, dtype = self.shapes[name], self.dtypes[name]
            isz = jnp.dtype(dtype).itemsize
            raw = jax.lax.slice(self.storage, (start,), (end,))
            view = jax.lax.bitcast_convert_type(raw.reshape(shape + (isz,)), dtype)
            setattr(self, name, view)

    def forward(self, x):
        B, D = x.shape
        assert D == self.d_in, f"expected {self.d_in} input features, got {D}"
        if self.d_in_p != self.d_in:
            # Only needed when d_in is not lane-aligned (not the case in the demo).
            x = jnp.pad(x, ((0, 0), (0, self.d_in_p - self.d_in)))
        # x stays in its native dtype; the kernel casts to the MXU dtype on the VPU.
        out = _mlp_forward(x, self.w1, self.b1, self.w2, self.b2,
                           tb=self.batch_tile, out_dtype=self.out_dtype)
        if self.d_out_p != self.d_out:
            out = out[:, : self.d_out]
        return out

    def __call__(self, x):
        return self.forward(x)


# ----------------------------------------------------------------------------
# Reference (plain JAX, identical casting pattern) for a correctness check
# ----------------------------------------------------------------------------
def _reference(module: ModuleWithStorage, x):
    cd = module.param_dtype
    if module.d_in_p != module.d_in:
        x = jnp.pad(x, ((0, 0), (0, module.d_in_p - module.d_in)))
    xb = x.astype(cd)
    h = jnp.dot(xb, module.w1, preferred_element_type=jnp.float32) + module.b1
    h = jnp.maximum(h, 0.0).astype(cd)
    o = jnp.dot(h, module.w2, preferred_element_type=jnp.float32) + module.b2
    return o[:, : module.d_out].astype(module.out_dtype)


if __name__ == "__main__":
    key = jax.random.PRNGKey(0)
    k_param, k_x = jax.random.split(key)

    # Small demo shapes: B=300 is NOT a multiple of the 256-row batch tile, so
    # this exercises both the multi-tile pipeline and the partial last tile.
    B, D_IN, D_HIDDEN, D_OUT = 300, 128, 256, 128
    module = ModuleWithStorage(D_IN, D_HIDDEN, D_OUT, k_param, batch_tile=256)

    x = jax.random.normal(k_x, (B, D_IN), jnp.float32)

    out = jax.block_until_ready(module(x))
    ref = jax.block_until_ready(_reference(module, x))

    assert out.shape == (B, D_OUT), out.shape
    assert out.dtype == module.out_dtype, out.dtype
    assert jnp.allclose(out.astype(jnp.float32), ref.astype(jnp.float32),
                        atol=2e-2, rtol=2e-2), "mismatch vs reference"

    print("KERNEL_OK")
</pallas_src>

<mosaic_0001>
module attributes {stable_mosaic.version = 11 : i64} {
  func.func @_mlp_kernel(%arg0: i32, %arg1: memref<256x128xf32, #tpu.memory_space<vmem>>, %arg2: memref<128x256xbf16, #tpu.memory_space<vmem>>, %arg3: memref<1x256xf32, #tpu.memory_space<vmem>>, %arg4: memref<256x128xbf16, #tpu.memory_space<vmem>>, %arg5: memref<1x128xf32, #tpu.memory_space<vmem>>, %arg6: memref<256x128xbf16, #tpu.memory_space<vmem>>) attributes {dimension_semantics = [#tpu.dimension_semantics<parallel>], iteration_bounds = array<i64: 2>, scalar_prefetch = 0 : i64, scratch_operands = 0 : i64, tpu.core_type = #tpu.core_type<tc>, window_params = [{transform_indices = @transform_0, window_bounds = array<i64: 256, 128>}, {pipeline_mode = #tpu.pipeline_mode<synchronous>, transform_indices = @transform_1, window_bounds = array<i64: 128, 256>}, {pipeline_mode = #tpu.pipeline_mode<synchronous>, transform_indices = @transform_2, window_bounds = array<i64: 1, 256>}, {pipeline_mode = #tpu.pipeline_mode<synchronous>, transform_indices = @transform_3, window_bounds = array<i64: 256, 128>}, {pipeline_mode = #tpu.pipeline_mode<synchronous>, transform_indices = @transform_4, window_bounds = array<i64: 1, 128>}, {transform_indices = @transform_5, window_bounds = array<i64: 256, 128>}]} {
    %c0 = arith.constant 0 : index
    %c0_0 = arith.constant 0 : index
    %0 = vector.load %arg1[%c0, %c0_0] : memref<256x128xf32, #tpu.memory_space<vmem>>, vector<256x128xf32>
    %1 = arith.truncf %0 : vector<256x128xf32> to vector<256x128xbf16>
    %c0_1 = arith.constant 0 : index
    %c0_2 = arith.constant 0 : index
    %2 = vector.load %arg2[%c0_1, %c0_2] : memref<128x256xbf16, #tpu.memory_space<vmem>>, vector<128x256xbf16>
    %cst = arith.constant dense<0.000000e+00> : vector<256x256xf32>
    %3 = tpu.matmul %1, %2, %cst {dimension_numbers = #tpu.dot_dimension_numbers<[1], [0], [0], [1], [0, 0, 1, 1], [], []>} : vector<256x128xbf16>, vector<128x256xbf16>, vector<256x256xf32> -> vector<256x256xf32>
    %c0_3 = arith.constant 0 : index
    %c0_4 = arith.constant 0 : index
    %4 = vector.load %arg3[%c0_3, %c0_4] : memref<1x256xf32, #tpu.memory_space<vmem>>, vector<1x256xf32>
    %5 = vector.broadcast %4 : vector<1x256xf32> to vector<256x256xf32>
    %6 = arith.addf %3, %5 : vector<256x256xf32>
    %cst_5 = arith.constant 0.000000e+00 : f32
    %7 = vector.broadcast %cst_5 : f32 to vector<256x256xf32>
    %8 = arith.maximumf %6, %7 : vector<256x256xf32>
    %9 = arith.truncf %8 : vector<256x256xf32> to vector<256x256xbf16>
    %c0_6 = arith.constant 0 : index
    %c0_7 = arith.constant 0 : index
    %10 = vector.load %arg4[%c0_6, %c0_7] : memref<256x128xbf16, #tpu.memory_space<vmem>>, vector<256x128xbf16>
    %cst_8 = arith.constant dense<0.000000e+00> : vector<256x128xf32>
    %11 = tpu.matmul %9, %10, %cst_8 {dimension_numbers = #tpu.dot_dimension_numbers<[1], [0], [0], [1], [0, 0, 1, 1], [], []>} : vector<256x256xbf16>, vector<256x128xbf16>, vector<256x128xf32> -> vector<256x128xf32>
    %c0_9 = arith.constant 0 : index
    %c0_10 = arith.constant 0 : index
    %12 = vector.load %arg5[%c0_9, %c0_10] : memref<1x128xf32, #tpu.memory_space<vmem>>, vector<1x128xf32>
    %13 = vector.broadcast %12 : vector<1x128xf32> to vector<256x128xf32>
    %14 = arith.addf %11, %13 : vector<256x128xf32>
    %15 = arith.truncf %14 : vector<256x128xf32> to vector<256x128xbf16>
    %c0_11 = arith.constant 0 : index
    %c0_12 = arith.constant 0 : index
    %16 = vector.load %arg6[%c0_11, %c0_12] : memref<256x128xbf16, #tpu.memory_space<vmem>>, vector<256x128xbf16>
    tpu.vector_store %arg6[%c0_11, %c0_12], %15 {strides = array<i32>} : memref<256x128xbf16, #tpu.memory_space<vmem>>, vector<256x128xbf16>,
    return
  }
  func.func @transform_0(%arg0: i32) -> (i32, i32) {
    %c0_i32 = arith.constant 0 : i32
    %c0_i32_0 = arith.constant 0 : i32
    return %arg0, %c0_i32 : i32, i32
  }
  func.func @transform_1(%arg0: i32) -> (i32, i32) {
    %c0_i32 = arith.constant 0 : i32
    %c0_i32_0 = arith.constant 0 : i32
    %c0_i32_1 = arith.constant 0 : i32
    return %c0_i32, %c0_i32_0 : i32, i32
  }
  func.func @transform_2(%arg0: i32) -> (i32, i32) {
    %c0_i32 = arith.constant 0 : i32
    %c0_i32_0 = arith.constant 0 : i32
    %c0_i32_1 = arith.constant 0 : i32
    return %c0_i32, %c0_i32_0 : i32, i32
  }
  func.func @transform_3(%arg0: i32) -> (i32, i32) {
    %c0_i32 = arith.constant 0 : i32
    %c0_i32_0 = arith.constant 0 : i32
    %c0_i32_1 = arith.constant 0 : i32
    return %c0_i32, %c0_i32_0 : i32, i32
  }
  func.func @transform_4(%arg0: i32) -> (i32, i32) {
    %c0_i32 = arith.constant 0 : i32
    %c0_i32_0 = arith.constant 0 : i32
    %c0_i32_1 = arith.constant 0 : i32
    return %c0_i32, %c0_i32_0 : i32, i32
  }
  func.func @transform_5(%arg0: i32) -> (i32, i32) {
    %c0_i32 = arith.constant 0 : i32
    %c0_i32_0 = arith.constant 0 : i32
    return %arg0, %c0_i32 : i32, i32
  }
}

module attributes {stable_mosaic.version = 11 : i64} {
  func.func @_mlp_kernel(%arg0: i32, %arg1: memref<256x128xf32, #tpu.memory_space<vmem>>, %arg2: memref<128x256xbf16, #tpu.memory_space<vmem>>, %arg3: memref<1x256xf32, #tpu.memory_space<vmem>>, %arg4: memref<256x128xbf16, #tpu.memory_space<vmem>>, %arg5: memref<1x128xf32, #tpu.memory_space<vmem>>, %arg6: memref<256x128xbf16, #tpu.memory_space<vmem>>) attributes {dimension_semantics = [#tpu.dimension_semantics<parallel>], iteration_bounds = array<i64: 2>, scalar_prefetch = 0 : i64, scratch_operands = 0 : i64, tpu.core_type = #tpu.core_type<tc>, window_params = [{transform_indices = @transform_0, window_bounds = array<i64: 256, 128>}, {pipeline_mode = #tpu.pipeline_mode<synchronous>, transform_indices = @transform_1, window_bounds = array<i64: 128, 256>}, {pipeline_mode = #tpu.pipeline_mode<synchronous>, transform_indices = @transform_2, window_bounds = array<i64: 1, 256>}, {pipeline_mode = #tpu.pipeline_mode<synchronous>, transform_indices = @transform_3, window_bounds = array<i64: 256, 128>}, {pipeline_mode = #tpu.pipeline_mode<synchronous>, transform_indices = @transform_4, window_bounds = array<i64: 1, 128>}, {transform_indices = @transform_5, window_bounds = array<i64: 256, 128>}]} {
    %c0 = arith.constant 0 : index
    %c0_0 = arith.constant 0 : index
    %0 = vector.load %arg1[%c0, %c0_0] : memref<256x128xf32, #tpu.memory_space<vmem>>, vector<256x128xf32>
    %1 = arith.truncf %0 : vector<256x128xf32> to vector<256x128xbf16>
    %c0_1 = arith.constant 0 : index
    %c0_2 = arith.constant 0 : index
    %2 = vector.load %arg2[%c0_1, %c0_2] : memref<128x256xbf16, #tpu.memory_space<vmem>>, vector<128x256xbf16>
    %cst = arith.constant dense<0.000000e+00> : vector<256x256xf32>
    %3 = tpu.matmul %1, %2, %cst {dimension_numbers = #tpu.dot_dimension_numbers<[1], [0], [0], [1], [0, 0, 1, 1], [], []>} : vector<256x128xbf16>, vector<128x256xbf16>, vector<256x256xf32> -> vector<256x256xf32>
    %c0_3 = arith.constant 0 : index
    %c0_4 = arith.constant 0 : index
    %4 = vector.load %arg3[%c0_3, %c0_4] : memref<1x256xf32, #tpu.memory_space<vmem>>, vector<1x256xf32>
    %5 = vector.broadcast %4 : vector<1x256xf32> to vector<256x256xf32>
    %6 = arith.addf %3, %5 : vector<256x256xf32>
    %cst_5 = arith.constant 0.000000e+00 : f32
    %7 = vector.broadcast %cst_5 : f32 to vector<256x256xf32>
    %8 = arith.maximumf %6, %7 : vector<256x256xf32>
    %9 = arith.truncf %8 : vector<256x256xf32> to vector<256x256xbf16>
    %c0_6 = arith.constant 0 : index
    %c0_7 = arith.constant 0 : index
    %10 = vector.load %arg4[%c0_6, %c0_7] : memref<256x128xbf16, #tpu.memory_space<vmem>>, vector<256x128xbf16>
    %cst_8 = arith.constant dense<0.000000e+00> : vector<256x128xf32>
    %11 = tpu.matmul %9, %10, %cst_8 {dimension_numbers = #tpu.dot_dimension_numbers<[1], [0], [0], [1], [0, 0, 1, 1], [], []>} : vector<256x256xbf16>, vector<256x128xbf16>, vector<256x128xf32> -> vector<256x128xf32>
    %c0_9 = arith.constant 0 : index
    %c0_10 = arith.constant 0 : index
    %12 = vector.load %arg5[%c0_9, %c0_10] : memref<1x128xf32, #tpu.memory_space<vmem>>, vector<1x128xf32>
    %13 = vector.broadcast %12 : vector<1x128xf32> to vector<256x128xf32>
    %14 = arith.addf %11, %13 : vector<256x128xf32>
    %15 = arith.truncf %14 : vector<256x128xf32> to vector<256x128xbf16>
    %c0_11 = arith.constant 0 : index
    %c0_12 = arith.constant 0 : index
    %16 = vector.load %arg6[%c0_11, %c0_12] : memref<256x128xbf16, #tpu.memory_space<vmem>>, vector<256x128xbf16>
    tpu.vector_store %arg6[%c0_11, %c0_12], %15 {strides = array<i32>} : memref<256x128xbf16, #tpu.memory_space<vmem>>, vector<256x128xbf16>,
    return
  }
  func.func @transform_0(%arg0: i32) -> (i32, i32) {
    %c0_i32 = arith.constant 0 : i32
    %c0_i32_0 = arith.constant 0 : i32
    return %arg0, %c0_i32 : i32, i32
  }
  func.func @transform_1(%arg0: i32) -> (i32, i32) {
    %c0_i32 = arith.constant 0 : i32
    %c0_i32_0 = arith.constant 0 : i32
    %c0_i32_1 = arith.constant 0 : i32
    return %c0_i32, %c0_i32_0 : i32, i32
  }
  func.func @transform_2(%arg0: i32) -> (i32, i32) {
    %c0_i32 = arith.constant 0 : i32
    %c0_i32_0 = arith.constant 0 : i32
    %c0_i32_1 = arith.constant 0 : i32
    return %c0_i32, %c0_i32_0 : i32, i32
  }
  func.func @transform_3(%arg0: i32) -> (i32, i32) {
    %c0_i32 = arith.constant 0 : i32
    %c0_i32_0 = arith.constant 0 : i32
    %c0_i32_1 = arith.constant 0 : i32
    return %c0_i32, %c0_i32_0 : i32, i32
  }
  func.func @transform_4(%arg0: i32) -> (i32, i32) {
    %c0_i32 = arith.constant 0 : i32
    %c0_i32_0 = arith.constant 0 : i32
    %c0_i32_1 = arith.constant 0 : i32
    return %c0_i32, %c0_i32_0 : i32, i32
  }
  func.func @transform_5(%arg0: i32) -> (i32, i32) {
    %c0_i32 = arith.constant 0 : i32
    %c0_i32_0 = arith.constant 0 : i32
    return %arg0, %c0_i32 : i32, i32
  }
}

</mosaic_0001>

<bundles_post_ra>
// kernel: _mlp_forward_impl.1
= control target key start
LH: loop header
LB: loop body
LE: loop exit
PB: predicated region body
PF: predicated region fallthrough
CT: control target
= control target key end

     0   :  { %s2233_s0 = inlined_call_operand.hbm [shape: f32[300,128], index: 0, kind: input, shape index: {}]   ;;  %s2234_s1 = inlined_call_operand.hbm [shape: bf16[128,256], index: 1, kind: input, shape index: {}]   ;;  %s2235_s2 = inlined_call_operand.hbm [shape: f32[1,256], index: 2, kind: input, shape index: {}]   ;;  %s2236_s3 = inlined_call_operand.hbm [shape: bf16[256,128], index: 3, kind: input, shape index: {}]   ;;  %s2237_s4 = inlined_call_operand.vmem [shape: f32[1,128], index: 4, kind: input, shape index: {}]   ;;  %s2238_s5 = inlined_call_operand.hbm [shape: bf16[300,128], index: 5, kind: output, shape index: {}]  }
   0x1   :  { %2241 = sst [smem:[#allocation15_spill]] %s2234_s1 }
   0x2   :  { %2242 = sst [smem:[#allocation16_spill]] %s2235_s2 }
   0x3   :  { %10 = vsyncpa [#allocation3], 0 }
   0x4   :  { %12 = vsyncpa [#allocation3 + $0x1], 0 }
   0x5   :  { %13 = vsyncpa [#allocation6], 0 }
   0x6   :  { %14 = vsyncpa [#allocation9], 0 }
   0x7   :  { %15 = vsyncpa [#allocation4], 0 }
   0x8   :  { %17 = vsyncpa [#allocation4 + $0x1], 0  ;;  %s1856_s18 = smov 0   ;;  %s1858_s19 = smov 0  }
   0x9   :  { %s1860_s20 = smov 0   ;;  %s1862_s21 = smov 0  }
   0xa LB: > { %s1877_s22 = sadd.s32 4294967295, %s1811_s21   ;;  %s1233_s23 = sadd.s32 4294967294, %s1811_s21   ;;  %s1811_s21 = sphi %s1862_s21, %s2262_s21   ;;  %s1807_s20 = sphi %s1860_s20, %s2261_s20   ;;  %s1803_s19 = sphi %s1858_s19, %s2260_s19   ;;  %s1799_s18 = sphi %s1856_s18, %s2259_s18  }
   0xb   : > { %s1881_s24 = sadd.s32 1, %s1811_s21   ;;  %s30_s25 = sadd.s32 1, %s1807_s20 }
   0xc   : > { %s27_s26 = ssub.s32 %s1811_s21, %s1881_s24  ;;  %p37_p0 = scmp.ne.s32.totalorder %s1807_s20, %s1803_s19 }
   0xd   : > { %p28_p1 = scmp.eq.s32.totalorder %s27_s26, 0  ;;  %p38_p2 = scmp.eq.s32.totalorder %s1811_s21, 0 }
   0xe   : > { %p43_p3 = scmp.ne.s32.totalorder %s1803_s19, %s1799_s18  ;;  %p2240_p4 = scmp.eq.s32.totalorder %s1877_s22, 0 }
   0xf   : > { %s1893_s27 = scalar_select %p28_p1, %s1807_s20, %s30_s25  }
  0x10   : > { %p1895_p5 = por %p38_p2, %p37_p0  ;;  %p1901_p6 = por %p2240_p4, %p43_p3 }
  0x11   : > { %p151_p7 = scmp.eq.s32.totalorder %s1877_s22, 1  ;;  %p157_p8 = scmp.eq.s32.totalorder %s1233_s23, 1 }
  0x12   : > { %p1234_p9 = scmp.ge.s32.totalorder %s1811_s21, 1  ;;  %p164_p10 = scmp.lt.s32.totalorder %s1811_s21, 3 }
  0x13   : > { %p1908_p11 = por %p151_p7, %p37_p0  ;;  %p1912_p12 = por %p157_p8, %p43_p3 }
  0x14   : > { %p1916_p13 = pnand %p1234_p9, %p164_p10  ;;  %s2248_s1 = sld [smem:[#allocation15_spill]] }
  0x15   : > { %s2246_s6 = scalar_select %p1912_p12, 1, 0 }
  0x16   : > { %p1532_p1 = pneg %p1916_p13  ;;  %s1813_s11 = smov [#allocation5]  }
  0x17   : > { %s177_s12 = sshll.u32 %s1813_s11, 4  ;;  %s2250_s2 = sld [smem:[#allocation16_spill]]  ;;  %s178_s12 = int_to_ptr.vmem [resolvable:$true] %s177_s12 }
  0x18   : > { %p1927_p0 = pnand %p1532_p1, %p2240_p4  ;;  %s1814_s17 = smov 128  }
  0x19   : > { %s1815_s23 = smov 8   ;;  %s201_s8 = sshll.u32 %s2236_s3, 4  ;;  %s202_s8 = int_to_ptr.hbm [resolvable:$true] %s201_s8 }
  0x1a   : > { %s175_s10 = sshll.u32 %s2248_s1, 4  ;;  %s1816_s9 = smov [#allocation7]   ;;  %s176_s10 = int_to_ptr.hbm [resolvable:$true] %s175_s10 }
  0x1b   : > { %1535 = dma.hbm_to_vmem [thread:$0]  (!%p1927_p0), %s176_s10, 2048, %s178_s12, [#allocation6], %s1814_s17, %s1814_s17, %s1815_s23  }
  0x1c   : > { %s192_s11 = sshll.u32 %s1816_s9, 4  ;;  %s1817_s14 = smov [#allocation8]   ;;  %s193_s11 = int_to_ptr.vmem [resolvable:$true] %s192_s11 }
  0x1d   : > { %s190_s16 = sshll.u32 %s2250_s2, 4  ;;  %s203_s15 = sshll.u32 %s1817_s14, 4  ;;  %s191_s16 = int_to_ptr.hbm [resolvable:$true] %s190_s16  ;;  %s204_s15 = int_to_ptr.vmem [resolvable:$true] %s203_s15 }
  0x1e   : > { %1538 = dma.hbm_to_vmem [thread:$0]  (!%p1927_p0), %s191_s16, 32, %s193_s11, [#allocation6]  }
  0x1f   : > { %s1818_s1 = smov 64   ;;  %s1819_s2 = smov 4  }
  0x20   : > { %1541 = dma.hbm_to_vmem [thread:$0]  (!%p1927_p0), %s202_s8, 2048, %s204_s15, [#allocation9], %s1818_s1, %s1818_s1, %s1819_s2  }
  0x21   : > { %p2239_p2 = scmp.ge.s32.totalorder %s1811_s21, 2 }
  0x23   : > { %216 = sbr.rel (%p2239_p2) target bundleno = 76 (0x4c), region = 32 }
  0x28   : > { %219 = sbr.rel (!%p1895_p5) target bundleno = 76 (0x4c), region = 36  ;;  %s220_s10 = sand.u32 (%p1895_p5), 1, %s1807_s20  }
  0x29   : > { %s1240_s12 = sshll.u32 (%p1895_p5), %s1811_s21, 5  ;;  %s1239_s16 = sshll.u32 (%p1895_p5), %s220_s10, 8 }
  0x2a   : > { %s226_s17 = ssub.s32 (%p1895_p5), 38, %s1240_s12  ;;  %s1953_s23 = scalar_lea.sflag (%p1895_p5), [#allocation3], %s220_s10 }
  0x2b   : > { %p227_p3 = scmp.lt.s32.totalorder (%p1895_p5), %s226_s17, 32  ;;  %s224_s25 = scalar_lea.vmem (%p1895_p5), [#allocation2], %s1239_s16 }
  0x2d   : > { %s2264_s17 = smov (!%p227_p3, %s226_s17), 32 }
  0x2e   : > { %s1241_s13 = sshll.u32 %s2264_s17, 3 }
  0x2f   : > { %s230_s1 = ssub.s32 256, %s1241_s13 }
  0x30   : > { %s231_s2 = sshll.u32 %s230_s1, 4 }
  0x31   : > { %232 = vsyncadd %s1953_s23, %s231_s2  ;;  %p1956_p5 = scmp.ne.s32.totalorder %s1241_s13, 0  ;;  %s1389_s26 = sshll.u32 %s1811_s21, 8 }
  0x32   : > { %s235_s11 = scalar_lea.hbm %s2233_s0, %s1389_s26  ;;  %s1964_s14 = sshll.u32 %s224_s25, 4  ;;  %s240_s14 = int_to_ptr.vmem [resolvable:$true] %s1964_s14 }
  0x33   : > { %s237_s15 = sshll.u32 %s235_s11, 4  ;;  %s1245_s10 = sshll.u32 %s2264_s17, 7  ;;  %s1967_s15 = int_to_ptr.hbm [resolvable:$true] %s237_s15 }
  0x34   : > { %s1687_s12 = sshra.s32 %s1967_s15, 4  ;;  %s1689_s16 = sshrl.u32 %s1245_s10, 4  ;;  %s1688_s12 = int_to_ptr.hbm [resolvable:$true] %s1687_s12 }
  0x35   : > { %s1694_s13 = scalar_lea.hbm %s1688_s12, %s1689_s16  ;;  %s1698_s25 = scalar_lea.hbm %s2233_s0, 304 }
  0x36   : > { %p1695_p7 = scmp.ne.s32.totalorder %s1688_s12, %s1694_s13  ;;  %p1699_p10 = scmp.lt.s32.totalorder %s1688_s12, %s2233_s0 }
  0x37   : > { %p1700_p1 = scmp.lt.s32.totalorder %s1698_s25, %s1694_s13 }
  0x38   : > { %p1696_p8 = pnand %p1695_p7, %p1956_p5 }
  0x39   : > { %p1701_p0 = por %p1700_p1, %p1699_p10 }
  0x3a   : > { %p1697_p9 = pneg %p1696_p8 }
  0x3c   : > { %p1702_p3 = pnand %p1701_p0, %p1697_p9 }
  0x3e   : > { %1705 = shalt.err (!%p1702_p3)
}
  0x3f   : > { %s1706_s9 = sshra.s32 %s240_s14, 4  ;;  %s1820_s1 = smov [#allocation2]   ;;  %s1707_s9 = int_to_ptr.vmem [resolvable:$true] %s1706_s9 }
  0x40   : > { %s1713_s11 = scalar_lea.vmem %s1707_s9, %s1689_s16  ;;  %s1717_s2 = scalar_lea.vmem %s1820_s1, 512 }
  0x41   : > { %p1714_p7 = scmp.ne.s32.totalorder %s1707_s9, %s1713_s11  ;;  %p1719_p4 = scmp.lt.s32.totalorder %s1717_s2, %s1713_s11 }
  0x43   : > { %p1715_p8 = pnand %p1714_p7, %p1956_p5 }
  0x45   : > { %p1716_p2 = pneg %p1715_p8 }
  0x47   : > { %p1721_p12 = pnand %p1719_p4, %p1716_p2 }
  0x49   : > { %1724 = shalt.err (!%p1721_p12)
}
  0x4a   : > { %s1821_s12 = smov 128   ;;  %s1822_s13 = smov 8  }
  0x4b   : > { %245 = dma.hbm_to_vmem [thread:$0]  (%p1956_p5), %s1967_s15, %s1245_s10, %s240_s14, %s1953_s23, %s1821_s12, %s1821_s12, %s1822_s13  }
  0x4c PF: > { %251 = sbr.rel (%p1916_p13) target bundleno = 680 (0x2a8), region = 40  ;;  %s1996_s16 = sand.u32 (!%p1916_p13), 1, %s1803_s19  }
  0x4d   : > { %s1247_s25 = sshll.u32 (!%p1916_p13), %s1996_s16, 8  ;;  %s254_s26 = scalar_lea.sflag (!%p1916_p13), [#allocation3], %s1996_s16 }
  0x4e   : > { %s2000_s8 = scalar_lea.vmem (!%p1916_p13), [#allocation2], %s1247_s25 }
  0x51   : > { %1782 = dma.done.wait (%p1901_p6), %s254_s26, 4096  }
  0x52   : > { %1784 = vsyncadd (%p1901_p6), %s254_s26, 4294963200  ;;  %p2252_p4 = scmp.eq.s32.totalorder %s1877_s22, 0 }
  0x54   : > { %1786 = dma.done.wait (%p2252_p4), [#allocation6], 2080   ;;  %p2253_p12 = pmov %p2252_p4 }
  0x55   : > { %p2254_p13 = pmov %p2252_p4 }
  0x56   : > { %1788 = vsyncadd (%p2253_p12), [#allocation6], 4294965216 }
  0x57   : > { %1790 = dma.done.wait (%p2254_p13), [#allocation9], 2048   ;;  %p2255_p2 = pmov %p2252_p4 }
  0x58   : > { %v1310_v0 = vld [vmem:[#allocation5 + $0x70] sm:$0xf]  ;;  %v1405_v1 = vld [vmem:[#allocation5 + $0x74] sm:$0xf0]  ;;  %v1404_v2 = vld [vmem:[#allocation5 + $0x74] sm:$0xf] }
  0x59   : > { %1792 = vsyncadd (%p2255_p2), [#allocation9], 4294965248  ;;  %v1311_v3 = vor.u32 %v1405_v1, %v1310_v0  ;;  %v1312_v4 = vld [vmem:[#allocation5 + $0x78] sm:$0xf0]  ;;  %v1302_v5 = vld [vmem:[#allocation5 + $0x60] sm:$0xf] }
  0x5a   : > { %v1403_v6 = vld [vmem:[#allocation5 + $0x64] sm:$0xf0]  ;;  %v1315_v7 = vor.u32 %v1404_v2, %v1312_v4  ;;  %v1402_v8 = vld [vmem:[#allocation5 + $0x64] sm:$0xf]  ;;  %v1304_v9 = vld [vmem:[#allocation5 + $0x68] sm:$0xf0] }
  0x5b   : > { %460 = vmatpush.bf16.msra.mxu0 %v1311_v3  ;;  %v1303_v10 = vor.u32 %v1403_v6, %v1302_v5  ;;  %v1307_v11 = vor.u32 %v1402_v8, %v1304_v9  ;;  %v1294_v12 = vld [vmem:[#allocation5 + $0x50] sm:$0xf]  ;;  %v1401_v13 = vld [vmem:[#allocation5 + $0x54] sm:$0xf0]  ;;  %v1400_v14 = vld [vmem:[#allocation5 + $0x54] sm:$0xf] }
  0x5c   : > { %549 = vmatpush.bf16.msra.mxu1 %v1315_v7  ;;  %v1296_v15 = vld [vmem:[#allocation5 + $0x58] sm:$0xf0]  ;;  %v1295_v16 = vor.u32 %v1401_v13, %v1294_v12  ;;  %v1286_v18 = vld [vmem:[#allocation5 + $0x40] sm:$0xf]  ;;  %v1399_v19 = vld [vmem:[#allocation5 + $0x44] sm:$0xf0] }
  0x5d   : > { %v1299_v17 = vor.u32 %v1400_v14, %v1296_v15  ;;  %v1398_v20 = vld [vmem:[#allocation5 + $0x44] sm:$0xf]  ;;  %v1288_v21 = vld [vmem:[#allocation5 + $0x48] sm:$0xf0]  ;;  %v1287_v22 = vor.u32 %v1399_v19, %v1286_v18  ;;  %v1278_v24 = vld [vmem:[#allocation5 + $0x30] sm:$0xf] }
  0x5e   : > { %v1291_v23 = vor.u32 %v1398_v20, %v1288_v21  ;;  %v1397_v25 = vld [vmem:[#allocation5 + $0x34] sm:$0xf0]  ;;  %v1396_v26 = vld [vmem:[#allocation5 + $0x34] sm:$0xf]  ;;  %v1280_v27 = vld [vmem:[#allocation5 + $0x38] sm:$0xf0] }
  0x5f   : > { %461 = vmatpush.bf16.msra.mxu0 %v1303_v10  ;;  %v1279_v28 = vor.u32 %v1397_v25, %v1278_v24  ;;  %v1283_v29 = vor.u32 %v1396_v26, %v1280_v27  ;;  %v1270_v30 = vld [vmem:[#allocation5 + $0x20] sm:$0xf]  ;;  %v1395_v31 = vld [vmem:[#allocation5 + $0x24] sm:$0xf0]  ;;  %v1394_v32 = vld [vmem:[#allocation5 + $0x24] sm:$0xf] }
  0x60   : > { %550 = vmatpush.bf16.msra.mxu1 %v1307_v11  ;;  %v1272_v33 = vld [vmem:[#allocation5 + $0x28] sm:$0xf0]  ;;  %v1271_v34 = vor.u32 %v1395_v31, %v1270_v30  ;;  %v1262_v36 = vld [vmem:[#allocation5 + $0x10] sm:$0xf]  ;;  %v1393_v37 = vld [vmem:[#allocation5 + $0x14] sm:$0xf0] }
  0x61   : > { %v1275_v35 = vor.u32 %v1394_v32, %v1272_v33  ;;  %v1392_v38 = vld [vmem:[#allocation5 + $0x14] sm:$0xf]  ;;  %v1264_v39 = vld [vmem:[#allocation5 + $0x18] sm:$0xf0]  ;;  %v1263_v40 = vor.u32 %v1393_v37, %v1262_v36  ;;  %v1254_v42 = vld [vmem:[#allocation5] sm:$0xf] }
  0x62   : > { %v1267_v41 = vor.u32 %v1392_v38, %v1264_v39  ;;  %v1391_v43 = vld [vmem:[#allocation5 + $0x4] sm:$0xf0]  ;;  %v1390_v44 = vld [vmem:[#allocation5 + $0x4] sm:$0xf]  ;;  %v1256_v45 = vld [vmem:[#allocation5 + $0x8] sm:$0xf0] }
  0x63   : > { %462 = vmatpush.bf16.msra.mxu0 %v1295_v16  ;;  %v1255_v46 = vor.u32 %v1391_v43, %v1254_v42  ;;  %v310_v47 = vld [vmem:[%s2000_s8] sm:$0xff]  ;;  %v311_v48 = vld [vmem:[%s2000_s8 + $0x8] sm:$0xff]  ;;  %v1259_v49 = vor.u32 %v1390_v44, %v1256_v45  ;;  %v312_v51 = vld [vmem:[%s2000_s8 + $0x10] sm:$0xff]  ;;  %s1251_s17 = sshll.u32 %s1996_s16, 7  ;;  %s1109_s28 = scalar_lea.sflag [#allocation4], %s1996_s16 }
  0x64   : > { %551 = vmatpush.bf16.msra.mxu1 %v1299_v17  ;;  %v342_v50 = vpack.c.bf16 %v311_v48, %v310_v47  ;;  %v313_v52 = vld [vmem:[%s2000_s8 + $0x18] sm:$0xff]  ;;  %v314_v54 = vld [vmem:[%s2000_s8 + $0x20] sm:$0xff]  ;;  %v315_v55 = vld [vmem:[%s2000_s8 + $0x28] sm:$0xff]  ;;  %s2098_s23 = scalar_lea.vmem [#allocation10], %s1251_s17  ;;  %s1381_s14 = sshll.u32 (%p1908_p11), %s1877_s22, 5 }
  0x65   : > { %v343_v53 = vpack.c.bf16 %v313_v52, %v312_v51  ;;  %v344_v56 = vpack.c.bf16 %v315_v55, %v314_v54  ;;  %v316_v57 = vld [vmem:[%s2000_s8 + $0x30] sm:$0xff]  ;;  %v317_v58 = vld [vmem:[%s2000_s8 + $0x38] sm:$0xff]  ;;  %v318_v60 = vld [vmem:[%s2000_s8 + $0x40] sm:$0xff]  ;;  %s1117_s15 = ssub.s32 (%p1908_p11), 38, %s1381_s14 }
  0x66   : > { %v345_v59 = vpack.c.bf16 %v317_v58, %v316_v57  ;;  %v319_v61 = vld [vmem:[%s2000_s8 + $0x48] sm:$0xff]  ;;  %v1413_v63 = vld [vmem:[#allocation8 + $0x38] sm:$0xff]  ;;  %v320_v1 = vld [vmem:[%s2000_s8 + $0x50] sm:$0xff]  ;;  %p1118_p6 = scmp.lt.s32.totalorder (%p1908_p11), %s1117_s15, 32 }
  0x67   : > { %463 = vmatpush.bf16.msra.mxu0 %v1287_v22  ;;  %v346_v62 = vpack.c.bf16 %v319_v61, %v318_v60  ;;  %v1421_v0 = vld [vmem:[#allocation8 + $0x78] sm:$0xff]  ;;  %866 = vmatpush.bf16.msra.mxu2 %v1413_v63  ;;  %v1412_v4 = vld [vmem:[#allocation8 + $0x30] sm:$0xff]  ;;  %v1411_v6 = vld [vmem:[#allocation8 + $0x28] sm:$0xff] }
  0x68   : > { %552 = vmatpush.bf16.msra.mxu1 %v1291_v23  ;;  %955 = vmatpush.bf16.msra.mxu3 %v1421_v0  ;;  %v321_v2 = vld [vmem:[%s2000_s8 + $0x58] sm:$0xff]  ;;  %v1419_v7 = vld [vmem:[#allocation8 + $0x68] sm:$0xff]  ;;  %v1410_v8 = vld [vmem:[#allocation8 + $0x20] sm:$0xff] }
  0x69   : > { %v347_v3 = vpack.c.bf16 %v321_v2, %v320_v1  ;;  %v1420_v5 = vld [vmem:[#allocation8 + $0x70] sm:$0xff]  ;;  %v1418_v9 = vld [vmem:[#allocation8 + $0x60] sm:$0xff]  ;;  %v1409_v13 = vld [vmem:[#allocation8 + $0x18] sm:$0xff] }
  0x6a   : > { %v322_v10 = vld [vmem:[%s2000_s8 + $0x60] sm:$0xff]  ;;  %v323_v11 = vld [vmem:[%s2000_s8 + $0x68] sm:$0xff]  ;;  %v1408_v15 = vld [vmem:[#allocation8 + $0x10] sm:$0xff] }
  0x6b   : > { %464 = vmatpush.bf16.msra.mxu0 %v1279_v28  ;;  %867 = vmatpush.bf16.msra.mxu2 %v1412_v4  ;;  %v348_v12 = vpack.c.bf16 %v323_v11, %v322_v10  ;;  %v1417_v14 = vld [vmem:[#allocation8 + $0x58] sm:$0xff]  ;;  %v1416_v16 = vld [vmem:[#allocation8 + $0x50] sm:$0xff]  ;;  %v1407_v17 = vld [vmem:[#allocation8 + $0x8] sm:$0xff] }
  0x6c   : > { %553 = vmatpush.bf16.msra.mxu1 %v1283_v29  ;;  %956 = vmatpush.bf16.msra.mxu3 %v1420_v5  ;;  %v1415_v18 = vld [vmem:[#allocation8 + $0x48] sm:$0xff]  ;;  %v1406_v19 = vld [vmem:[#allocation8] sm:$0xff]  ;;  %v325_v22 = vld [vmem:[%s2000_s8 + $0x78] sm:$0xff] }
  0x6d   : > { %v1414_v20 = vld [vmem:[#allocation8 + $0x40] sm:$0xff]  ;;  %v324_v21 = vld [vmem:[%s2000_s8 + $0x70] sm:$0xff]  ;;  %v374_v27 = vld [vmem:[#allocation7] sm:$0x3] }
  0x6e   : > { %v349_v23 = vpack.c.bf16 %v325_v22, %v324_v21  ;;  %v326_v24 = vld [vmem:[%s2000_s8 + $0x80] sm:$0xff]  ;;  %v327_v25 = vld [vmem:[%s2000_s8 + $0x88] sm:$0xff]  ;;  %v2032_v30 = vperm.slane %v374_v27, 0  ;;  %v2034_v31 = vperm.slane %v374_v27, 1  ;;  %v328_v42 = vld [vmem:[%s2000_s8 + $0x90] sm:$0xff] }
  0x6f   : > { %465 = vmatpush.bf16.msra.mxu0 %v1271_v34  ;;  %868 = vmatpush.bf16.msra.mxu2 %v1411_v6  ;;  %v350_v26 = vpack.c.bf16 %v327_v25, %v326_v24  ;;  %v329_v43 = vld [vmem:[%s2000_s8 + $0x98] sm:$0xff]  ;;  %v331_v60 = vld [vmem:[%s2000_s8 + $0xa8] sm:$0xff] }
  0x70   : > { %554 = vmatpush.bf16.msra.mxu1 %v1275_v35  ;;  %957 = vmatpush.bf16.msra.mxu3 %v1419_v7 }
  0x73   : > { %466 = vmatpush.bf16.msra.mxu0 %v1263_v40  ;;  %869 = vmatpush.bf16.msra.mxu2 %v1410_v8 }
  0x74   : > { %555 = vmatpush.bf16.msra.mxu1 %v1267_v41  ;;  %958 = vmatpush.bf16.msra.mxu3 %v1418_v9 }
  0x77   : > { %467 = vmatpush.bf16.msra.mxu0 %v1255_v46  ;;  %870 = vmatpush.bf16.msra.mxu2 %v1409_v13  ;;  %v351_v46 = vpack.c.bf16 %v329_v43, %v328_v42  ;;  %v333_v13 = vld [vmem:[%s2000_s8 + $0xb8] sm:$0xff] }
  0x78   : > { %556 = vmatpush.bf16.msra.mxu1 %v1259_v49  ;;  %959 = vmatpush.bf16.msra.mxu3 %v1417_v14 }
  0x7a   : > { %468 = vmatmul.bf16.vlgmr.msra.gmra.mxu0 %v342_v50 }
  0x7b   : > { %557 = vmatmul.bf16.vlgmr.msra.gmra.mxu1 %v342_v50  ;;  %871 = vmatpush.bf16.msra.mxu2 %v1408_v15 }
  0x7c   : > { %960 = vmatpush.bf16.msra.mxu3 %v1416_v16 }
  0x7f   : > { %872 = vmatpush.bf16.msra.mxu2 %v1407_v17 }
  0x80   : > { %961 = vmatpush.bf16.msra.mxu3 %v1415_v18 }
  0x83   : > { %873 = vmatpush.bf16.msra.mxu2 %v1406_v19 }
  0x84   : > { %962 = vmatpush.bf16.msra.mxu3 %v1414_v20 }
  0x8a   : > { %473 = vmatmul.bf16.gmra.mxu0 %v343_v53 }
  0x8b   : > { %562 = vmatmul.bf16.gmra.mxu1 %v343_v53 }
  0x9a   : > { %478 = vmatmul.bf16.gmra.mxu0 %v344_v56 }
  0x9b   : > { %567 = vmatmul.bf16.gmra.mxu1 %v344_v56 }
  0xaa   : > { %483 = vmatmul.bf16.gmra.mxu0 %v345_v59 }
  0xab   : > { %572 = vmatmul.bf16.gmra.mxu1 %v345_v59  ;;  %v330_v59 = vld [vmem:[%s2000_s8 + $0xa0] sm:$0xff] }
  0xac   : > { %v352_v63 = vpack.c.bf16 %v331_v60, %v330_v59 }
  0xba   : > { %488 = vmatmul.bf16.gmra.mxu0 %v346_v62 }
  0xbb   : > { %577 = vmatmul.bf16.gmra.mxu1 %v346_v62 }
  0xca   : > { %493 = vmatmul.bf16.gmra.mxu0 %v347_v3 }
  0xcb   : > { %582 = vmatmul.bf16.gmra.mxu1 %v347_v3 }
  0xda   : > { %498 = vmatmul.bf16.gmra.mxu0 %v348_v12 }
  0xdb   : > { %587 = vmatmul.bf16.gmra.mxu1 %v348_v12  ;;  %v332_v12 = vld [vmem:[%s2000_s8 + $0xb0] sm:$0xff] }
  0xdc   : > { %v353_v16 = vpack.c.bf16 %v333_v13, %v332_v12 }
  0xea   : > { %503 = vmatmul.bf16.gmra.mxu0 %v349_v23 }
  0xeb   : > { %592 = vmatmul.bf16.gmra.mxu1 %v349_v23 }
  0xf7   : > { %v469_v28 = vpop.f32.mrf.mxu0 }
  0xf8   : > { %v558_v29 = vpop.f32.mrf.mxu1  ;;  %v470_v32 = vadd.f32 %v469_v28, %v2032_v30 }
  0xf9   : > { %v559_v33 = vadd.f32 %v558_v29, %v2034_v31  ;;  %v334_v29 = vld [vmem:[%s2000_s8 + $0xc0] sm:$0xff] }
  0xfa   : > { %508 = vmatmul.bf16.gmra.mxu0 %v350_v26  ;;  %v638_v38 = vmax.f32 %v470_v32, 0.0  ;;  %v335_v32 = vld [vmem:[%s2000_s8 + $0xc8] sm:$0xff] }
  0xfb   : > { %597 = vmatmul.bf16.gmra.mxu1 %v350_v26  ;;  %v639_v40 = vmax.f32 %v559_v33, 0.0 }
  0xff   : > { %v471_v34 = vpop.f32.mrf.mxu0 }
 0x100   : > { %v472_v35 = vadd.f32 %v471_v34, %v2032_v30  ;;  %v560_v36 = vpop.f32.mrf.mxu1 }
 0x101   : > { %v561_v37 = vadd.f32 %v560_v36, %v2034_v31 }
 0x102   : > { %v640_v39 = vmax.f32 %v472_v35, 0.0  ;;  %v354_v35 = vpack.c.bf16 %v335_v32, %v334_v29 }
 0x103   : > { %v641_v41 = vmax.f32 %v561_v37, 0.0 }
 0x104   : > { %v702_v44 = vpack.c.bf16 %v640_v39, %v638_v38 }
 0x105   : > { %v703_v45 = vpack.c.bf16 %v641_v41, %v639_v40 }
 0x106   : > { %874 = vmatmul.bf16.vlgmr.msra.gmra.mxu2 %v702_v44 }
 0x107   : > { %963 = vmatmul.bf16.vlgmr.msra.gmra.mxu3 %v703_v45  ;;  %v474_v47 = vpop.f32.mrf.mxu0 }
 0x108   : > { %v563_v48 = vpop.f32.mrf.mxu1  ;;  %v475_v49 = vadd.f32 %v474_v47, %v2032_v30 }
 0x109   : > { %v564_v50 = vadd.f32 %v563_v48, %v2034_v31  ;;  %v336_v48 = vld [vmem:[%s2000_s8 + $0xd0] sm:$0xff] }
 0x10a   : > { %513 = vmatmul.bf16.gmra.mxu0 %v351_v46  ;;  %v642_v55 = vmax.f32 %v475_v49, 0.0  ;;  %v337_v49 = vld [vmem:[%s2000_s8 + $0xd8] sm:$0xff] }
 0x10b   : > { %602 = vmatmul.bf16.gmra.mxu1 %v351_v46  ;;  %v643_v57 = vmax.f32 %v564_v50, 0.0 }
 0x10f   : > { %v476_v51 = vpop.f32.mrf.mxu0 }
 0x110   : > { %v477_v52 = vadd.f32 %v476_v51, %v2032_v30  ;;  %v565_v53 = vpop.f32.mrf.mxu1 }
 0x111   : > { %v566_v54 = vadd.f32 %v565_v53, %v2034_v31 }
 0x112   : > { %v644_v56 = vmax.f32 %v477_v52, 0.0  ;;  %v355_v52 = vpack.c.bf16 %v337_v49, %v336_v48 }
 0x113   : > { %v645_v58 = vmax.f32 %v566_v54, 0.0 }
 0x114   : > { %v704_v61 = vpack.c.bf16 %v644_v56, %v642_v55 }
 0x115   : > { %v705_v62 = vpack.c.bf16 %v645_v58, %v643_v57 }
 0x116   : > { %879 = vmatmul.bf16.gmra.mxu2 %v704_v61 }
 0x117   : > { %968 = vmatmul.bf16.gmra.mxu3 %v705_v62  ;;  %v479_v0 = vpop.f32.mrf.mxu0 }
 0x118   : > { %v568_v1 = vpop.f32.mrf.mxu1  ;;  %v480_v2 = vadd.f32 %v479_v0, %v2032_v30 }
 0x119   : > { %v569_v3 = vadd.f32 %v568_v1, %v2034_v31  ;;  %v338_v1 = vld [vmem:[%s2000_s8 + $0xe0] sm:$0xff] }
 0x11a   : > { %518 = vmatmul.bf16.gmra.mxu0 %v352_v63  ;;  %v646_v8 = vmax.f32 %v480_v2, 0.0  ;;  %v339_v2 = vld [vmem:[%s2000_s8 + $0xe8] sm:$0xff] }
 0x11b   : > { %607 = vmatmul.bf16.gmra.mxu1 %v352_v63  ;;  %v647_v10 = vmax.f32 %v569_v3, 0.0 }
 0x11f   : > { %v481_v4 = vpop.f32.mrf.mxu0 }
 0x120   : > { %v482_v5 = vadd.f32 %v481_v4, %v2032_v30  ;;  %v570_v6 = vpop.f32.mrf.mxu1 }
 0x121   : > { %v571_v7 = vadd.f32 %v570_v6, %v2034_v31 }
 0x122   : > { %v648_v9 = vmax.f32 %v482_v5, 0.0  ;;  %v356_v5 = vpack.c.bf16 %v339_v2, %v338_v1 }
 0x123   : > { %v649_v11 = vmax.f32 %v571_v7, 0.0 }
 0x124   : > { %v706_v14 = vpack.c.bf16 %v648_v9, %v646_v8 }
 0x125   : > { %v707_v15 = vpack.c.bf16 %v649_v11, %v647_v10 }
 0x126   : > { %884 = vmatmul.bf16.gmra.mxu2 %v706_v14 }
 0x127   : > { %973 = vmatmul.bf16.gmra.mxu3 %v707_v15  ;;  %v484_v17 = vpop.f32.mrf.mxu0 }
 0x128   : > { %v573_v18 = vpop.f32.mrf.mxu1  ;;  %v485_v19 = vadd.f32 %v484_v17, %v2032_v30 }
 0x129   : > { %v574_v20 = vadd.f32 %v573_v18, %v2034_v31  ;;  %v340_v18 = vld [vmem:[%s2000_s8 + $0xf0] sm:$0xff] }
 0x12a   : > { %523 = vmatmul.bf16.gmra.mxu0 %v353_v16  ;;  %v650_v25 = vmax.f32 %v485_v19, 0.0  ;;  %v341_v19 = vld [vmem:[%s2000_s8 + $0xf8] sm:$0xff] }
 0x12b   : > { %612 = vmatmul.bf16.gmra.mxu1 %v353_v16  ;;  %v651_v27 = vmax.f32 %v574_v20, 0.0 }
 0x12f   : > { %v486_v21 = vpop.f32.mrf.mxu0 }
 0x130   : > { %v487_v22 = vadd.f32 %v486_v21, %v2032_v30  ;;  %v575_v23 = vpop.f32.mrf.mxu1 }
 0x131   : > { %v576_v24 = vadd.f32 %v575_v23, %v2034_v31 }
 0x132   : > { %v652_v26 = vmax.f32 %v487_v22, 0.0  ;;  %v357_v22 = vpack.c.bf16 %v341_v19, %v340_v18 }
 0x133   : > { %v653_v28 = vmax.f32 %v576_v24, 0.0 }
 0x134   : > { %v708_v33 = vpack.c.bf16 %v652_v26, %v650_v25 }
 0x135   : > { %v709_v34 = vpack.c.bf16 %v653_v28, %v651_v27 }
 0x136   : > { %889 = vmatmul.bf16.gmra.mxu2 %v708_v33 }
 0x137   : > { %978 = vmatmul.bf16.gmra.mxu3 %v709_v34  ;;  %v489_v36 = vpop.f32.mrf.mxu0 }
 0x138   : > { %v578_v37 = vpop.f32.mrf.mxu1  ;;  %v490_v38 = vadd.f32 %v489_v36, %v2032_v30 }
 0x139   : > { %v579_v39 = vadd.f32 %v578_v37, %v2034_v31 }
 0x13a   : > { %528 = vmatmul.bf16.gmra.mxu0 %v354_v35  ;;  %v654_v44 = vmax.f32 %v490_v38, 0.0 }
 0x13b   : > { %617 = vmatmul.bf16.gmra.mxu1 %v354_v35  ;;  %v655_v46 = vmax.f32 %v579_v39, 0.0 }
 0x13f   : > { %v491_v40 = vpop.f32.mrf.mxu0 }
 0x140   : > { %v492_v41 = vadd.f32 %v491_v40, %v2032_v30  ;;  %v580_v42 = vpop.f32.mrf.mxu1 }
 0x141   : > { %v581_v43 = vadd.f32 %v580_v42, %v2034_v31 }
 0x142   : > { %v656_v45 = vmax.f32 %v492_v41, 0.0 }
 0x143   : > { %v657_v47 = vmax.f32 %v581_v43, 0.0 }
 0x144   : > { %v710_v50 = vpack.c.bf16 %v656_v45, %v654_v44 }
 0x145   : > { %v711_v51 = vpack.c.bf16 %v657_v47, %v655_v46 }
 0x146   : > { %894 = vmatmul.bf16.gmra.mxu2 %v710_v50 }
 0x147   : > { %983 = vmatmul.bf16.gmra.mxu3 %v711_v51  ;;  %v494_v53 = vpop.f32.mrf.mxu0 }
 0x148   : > { %v583_v54 = vpop.f32.mrf.mxu1  ;;  %v495_v55 = vadd.f32 %v494_v53, %v2032_v30 }
 0x149   : > { %v584_v56 = vadd.f32 %v583_v54, %v2034_v31 }
 0x14a   : > { %533 = vmatmul.bf16.gmra.mxu0 %v355_v52  ;;  %v658_v61 = vmax.f32 %v495_v55, 0.0 }
 0x14b   : > { %622 = vmatmul.bf16.gmra.mxu1 %v355_v52  ;;  %v659_v63 = vmax.f32 %v584_v56, 0.0 }
 0x14f   : > { %v496_v57 = vpop.f32.mrf.mxu0 }
 0x150   : > { %v497_v58 = vadd.f32 %v496_v57, %v2032_v30  ;;  %v585_v59 = vpop.f32.mrf.mxu1  ;;  %v2089_v57 = vld [vmem:[%s2237_s4] ss:$0 sm:$0xff] }
 0x151   : > { %v586_v60 = vadd.f32 %v585_v59, %v2034_v31 }
 0x152   : > { %v660_v62 = vmax.f32 %v497_v58, 0.0 }
 0x153   : > { %v661_v0 = vmax.f32 %v586_v60, 0.0 }
 0x154   : > { %v712_v3 = vpack.c.bf16 %v660_v62, %v658_v61 }
 0x155   : > { %v713_v4 = vpack.c.bf16 %v661_v0, %v659_v63 }
 0x156   : > { %899 = vmatmul.bf16.gmra.mxu2 %v712_v3 }
 0x157   : > { %988 = vmatmul.bf16.gmra.mxu3 %v713_v4  ;;  %v499_v6 = vpop.f32.mrf.mxu0 }
 0x158   : > { %v588_v7 = vpop.f32.mrf.mxu1  ;;  %v500_v8 = vadd.f32 %v499_v6, %v2032_v30 }
 0x159   : > { %v589_v9 = vadd.f32 %v588_v7, %v2034_v31 }
 0x15a   : > { %538 = vmatmul.bf16.gmra.mxu0 %v356_v5  ;;  %v662_v14 = vmax.f32 %v500_v8, 0.0 }
 0x15b   : > { %627 = vmatmul.bf16.gmra.mxu1 %v356_v5  ;;  %v663_v16 = vmax.f32 %v589_v9, 0.0 }
 0x15f   : > { %v501_v10 = vpop.f32.mrf.mxu0 }
 0x160   : > { %v502_v11 = vadd.f32 %v501_v10, %v2032_v30  ;;  %v590_v12 = vpop.f32.mrf.mxu1 }
 0x161   : > { %v591_v13 = vadd.f32 %v590_v12, %v2034_v31 }
 0x162   : > { %v664_v15 = vmax.f32 %v502_v11, 0.0 }
 0x163   : > { %v665_v17 = vmax.f32 %v591_v13, 0.0 }
 0x164   : > { %v714_v20 = vpack.c.bf16 %v664_v15, %v662_v14 }
 0x165   : > { %v715_v21 = vpack.c.bf16 %v665_v17, %v663_v16 }
 0x166   : > { %904 = vmatmul.bf16.gmra.mxu2 %v714_v20 }
 0x167   : > { %993 = vmatmul.bf16.gmra.mxu3 %v715_v21  ;;  %v504_v23 = vpop.f32.mrf.mxu0 }
 0x168   : > { %v593_v24 = vpop.f32.mrf.mxu1  ;;  %v505_v25 = vadd.f32 %v504_v23, %v2032_v30 }
 0x169   : > { %v594_v26 = vadd.f32 %v593_v24, %v2034_v31 }
 0x16a   : > { %543 = vmatmul.bf16.gmra.mxu0 %v357_v22  ;;  %v666_v33 = vmax.f32 %v505_v25, 0.0 }
 0x16b   : > { %632 = vmatmul.bf16.gmra.mxu1 %v357_v22  ;;  %v667_v35 = vmax.f32 %v594_v26, 0.0 }
 0x16f   : > { %v506_v27 = vpop.f32.mrf.mxu0 }
 0x170   : > { %v507_v28 = vadd.f32 %v506_v27, %v2032_v30  ;;  %v595_v29 = vpop.f32.mrf.mxu1 }
 0x171   : > { %v596_v32 = vadd.f32 %v595_v29, %v2034_v31 }
 0x172   : > { %v668_v34 = vmax.f32 %v507_v28, 0.0 }
 0x173   : > { %v669_v36 = vmax.f32 %v596_v32, 0.0 }
 0x174   : > { %v716_v37 = vpack.c.bf16 %v668_v34, %v666_v33 }
 0x175   : > { %v717_v38 = vpack.c.bf16 %v669_v36, %v667_v35 }
 0x176   : > { %909 = vmatmul.bf16.gmra.mxu2 %v716_v37 }
 0x177   : > { %998 = vmatmul.bf16.gmra.mxu3 %v717_v38  ;;  %v509_v39 = vpop.f32.mrf.mxu0 }
 0x178   : > { %v598_v40 = vpop.f32.mrf.mxu1  ;;  %v510_v41 = vadd.f32 %v509_v39, %v2032_v30 }
 0x179   : > { %v599_v42 = vadd.f32 %v598_v40, %v2034_v31 }
 0x17a   : > { %v670_v47 = vmax.f32 %v510_v41, 0.0 }
 0x17b   : > { %v671_v49 = vmax.f32 %v599_v42, 0.0 }
 0x17f   : > { %v511_v43 = vpop.f32.mrf.mxu0 }
 0x180   : > { %v512_v44 = vadd.f32 %v511_v43, %v2032_v30  ;;  %v600_v45 = vpop.f32.mrf.mxu1 }
 0x181   : > { %v601_v46 = vadd.f32 %v600_v45, %v2034_v31 }
 0x182   : > { %v672_v48 = vmax.f32 %v512_v44, 0.0 }
 0x183   : > { %v673_v50 = vmax.f32 %v601_v46, 0.0 }
 0x184   : > { %v718_v51 = vpack.c.bf16 %v672_v48, %v670_v47 }
 0x185   : > { %v719_v52 = vpack.c.bf16 %v673_v50, %v671_v49 }
 0x186   : > { %914 = vmatmul.bf16.gmra.mxu2 %v718_v51 }
 0x187   : > { %1003 = vmatmul.bf16.gmra.mxu3 %v719_v52  ;;  %v514_v53 = vpop.f32.mrf.mxu0 }
 0x188   : > { %v603_v54 = vpop.f32.mrf.mxu1  ;;  %v515_v58 = vadd.f32 %v514_v53, %v2032_v30 }
 0x189   : > { %v875_v55 = vpop.f32.mrf.mxu2  ;;  %v604_v59 = vadd.f32 %v603_v54, %v2034_v31 }
 0x18a   : > { %v964_v56 = vpop.f32.mrf.mxu3  ;;  %v876_v61 = vadd.f32 %v2089_v57, %v875_v55  ;;  %v674_v2 = vmax.f32 %v515_v58, 0.0 }
 0x18b   : > { %v675_v6 = vmax.f32 %v604_v59, 0.0 }
 0x18c   : > { %v965_v8 = vadd.f32 %v964_v56, %v876_v61 }
 0x18f   : > { %v516_v60 = vpop.f32.mrf.mxu0 }
 0x190   : > { %v517_v62 = vadd.f32 %v516_v60, %v2032_v30  ;;  %v605_v63 = vpop.f32.mrf.mxu1 }
 0x191   : > { %v606_v0 = vadd.f32 %v605_v63, %v2034_v31  ;;  %v877_v1 = vpop.f32.mrf.mxu2 }
 0x192   : > { %v676_v3 = vmax.f32 %v517_v62, 0.0  ;;  %v878_v4 = vadd.f32 %v2089_v57, %v877_v1  ;;  %v966_v5 = vpop.f32.mrf.mxu3 }
 0x193   : > { %v677_v7 = vmax.f32 %v606_v0, 0.0 }
 0x194   : > { %v967_v9 = vadd.f32 %v966_v5, %v878_v4  ;;  %v720_v10 = vpack.c.bf16 %v676_v3, %v674_v2 }
 0x195   : > { %v721_v11 = vpack.c.bf16 %v677_v7, %v675_v6 }
 0x196   : > { %v1426_v12 = vpack.c.bf16 %v967_v9, %v965_v8  ;;  %919 = vmatmul.bf16.gmra.mxu2 %v720_v10 }
 0x197   : > { %1008 = vmatmul.bf16.gmra.mxu3 %v721_v11  ;;  %v519_v13 = vpop.f32.mrf.mxu0 }
 0x198   : > { %1427 = vst [vmem:[%s2098_s23] sm:$0xff] %v1426_v12   ;;  %v608_v14 = vpop.f32.mrf.mxu1  ;;  %v520_v17 = vadd.f32 %v519_v13, %v2032_v30 }
 0x199   : > { %v880_v15 = vpop.f32.mrf.mxu2  ;;  %v609_v18 = vadd.f32 %v608_v14, %v2034_v31 }
 0x19a   : > { %v969_v16 = vpop.f32.mrf.mxu3  ;;  %v881_v20 = vadd.f32 %v2089_v57, %v880_v15  ;;  %v678_v25 = vmax.f32 %v520_v17, 0.0 }
 0x19b   : > { %v679_v29 = vmax.f32 %v609_v18, 0.0 }
 0x19c   : > { %v970_v33 = vadd.f32 %v969_v16, %v881_v20 }
 0x19f   : > { %v521_v19 = vpop.f32.mrf.mxu0 }
 0x1a0   : > { %v522_v21 = vadd.f32 %v521_v19, %v2032_v30  ;;  %v610_v22 = vpop.f32.mrf.mxu1 }
 0x1a1   : > { %v611_v23 = vadd.f32 %v610_v22, %v2034_v31  ;;  %v882_v24 = vpop.f32.mrf.mxu2 }
 0x1a2   : > { %v680_v26 = vmax.f32 %v522_v21, 0.0  ;;  %v883_v27 = vadd.f32 %v2089_v57, %v882_v24  ;;  %v971_v28 = vpop.f32.mrf.mxu3 }
 0x1a3   : > { %v681_v32 = vmax.f32 %v611_v23, 0.0 }
 0x1a4   : > { %v972_v34 = vadd.f32 %v971_v28, %v883_v27  ;;  %v722_v35 = vpack.c.bf16 %v680_v26, %v678_v25 }
 0x1a5   : > { %v723_v36 = vpack.c.bf16 %v681_v32, %v679_v29 }
 0x1a6   : > { %v1431_v37 = vpack.c.bf16 %v972_v34, %v970_v33  ;;  %924 = vmatmul.bf16.gmra.mxu2 %v722_v35 }
 0x1a7   : > { %1013 = vmatmul.bf16.gmra.mxu3 %v723_v36  ;;  %v524_v38 = vpop.f32.mrf.mxu0 }
 0x1a8   : > { %1503 = vst [vmem:[%s2098_s23 + $0x8] sm:$0xff] %v1431_v37   ;;  %v613_v39 = vpop.f32.mrf.mxu1  ;;  %v525_v42 = vadd.f32 %v524_v38, %v2032_v30 }
 0x1a9   : > { %v885_v40 = vpop.f32.mrf.mxu2  ;;  %v614_v43 = vadd.f32 %v613_v39, %v2034_v31 }
 0x1aa   : > { %v974_v41 = vpop.f32.mrf.mxu3  ;;  %v886_v45 = vadd.f32 %v2089_v57, %v885_v40  ;;  %v682_v50 = vmax.f32 %v525_v42, 0.0 }
 0x1ab   : > { %v683_v54 = vmax.f32 %v614_v43, 0.0 }
 0x1ac   : > { %v975_v56 = vadd.f32 %v974_v41, %v886_v45 }
 0x1af   : > { %v526_v44 = vpop.f32.mrf.mxu0 }
 0x1b0   : > { %v527_v46 = vadd.f32 %v526_v44, %v2032_v30  ;;  %v615_v47 = vpop.f32.mrf.mxu1 }
 0x1b1   : > { %v616_v48 = vadd.f32 %v615_v47, %v2034_v31  ;;  %v887_v49 = vpop.f32.mrf.mxu2 }
 0x1b2   : > { %v684_v51 = vmax.f32 %v527_v46, 0.0  ;;  %v888_v52 = vadd.f32 %v2089_v57, %v887_v49  ;;  %v976_v53 = vpop.f32.mrf.mxu3 }
 0x1b3   : > { %v685_v55 = vmax.f32 %v616_v48, 0.0 }
 0x1b4   : > { %v977_v58 = vadd.f32 %v976_v53, %v888_v52  ;;  %v724_v59 = vpack.c.bf16 %v684_v51, %v682_v50 }
 0x1b5   : > { %v725_v60 = vpack.c.bf16 %v685_v55, %v683_v54 }
 0x1b6   : > { %v1436_v61 = vpack.c.bf16 %v977_v58, %v975_v56  ;;  %929 = vmatmul.bf16.gmra.mxu2 %v724_v59 }
 0x1b7   : > { %1018 = vmatmul.bf16.gmra.mxu3 %v725_v60  ;;  %v529_v62 = vpop.f32.mrf.mxu0 }
 0x1b8   : > { %1504 = vst [vmem:[%s2098_s23 + $0x10] sm:$0xff] %v1436_v61   ;;  %v618_v63 = vpop.f32.mrf.mxu1  ;;  %v530_v2 = vadd.f32 %v529_v62, %v2032_v30 }
 0x1b9   : > { %v890_v0 = vpop.f32.mrf.mxu2  ;;  %v619_v3 = vadd.f32 %v618_v63, %v2034_v31 }
 0x1ba   : > { %v979_v1 = vpop.f32.mrf.mxu3  ;;  %v891_v5 = vadd.f32 %v2089_v57, %v890_v0  ;;  %v686_v10 = vmax.f32 %v530_v2, 0.0 }
 0x1bb   : > { %v687_v14 = vmax.f32 %v619_v3, 0.0 }
 0x1bc   : > { %v980_v16 = vadd.f32 %v979_v1, %v891_v5 }
 0x1bf   : > { %v531_v4 = vpop.f32.mrf.mxu0 }
 0x1c0   : > { %v532_v6 = vadd.f32 %v531_v4, %v2032_v30  ;;  %v620_v7 = vpop.f32.mrf.mxu1 }
 0x1c1   : > { %v621_v8 = vadd.f32 %v620_v7, %v2034_v31  ;;  %v892_v9 = vpop.f32.mrf.mxu2 }
 0x1c2   : > { %v688_v11 = vmax.f32 %v532_v6, 0.0  ;;  %v893_v12 = vadd.f32 %v2089_v57, %v892_v9  ;;  %v981_v13 = vpop.f32.mrf.mxu3 }
 0x1c3   : > { %v689_v15 = vmax.f32 %v621_v8, 0.0 }
 0x1c4   : > { %v726_v17 = vpack.c.bf16 %v688_v11, %v686_v10  ;;  %v982_v18 = vadd.f32 %v981_v13, %v893_v12 }
 0x1c5   : > { %v727_v19 = vpack.c.bf16 %v689_v15, %v687_v14 }
 0x1c6   : > { %v1441_v20 = vpack.c.bf16 %v982_v18, %v980_v16  ;;  %934 = vmatmul.bf16.gmra.mxu2 %v726_v17 }
 0x1c7   : > { %1023 = vmatmul.bf16.gmra.mxu3 %v727_v19  ;;  %v534_v21 = vpop.f32.mrf.mxu0 }
 0x1c8   : > { %1505 = vst [vmem:[%s2098_s23 + $0x18] sm:$0xff] %v1441_v20   ;;  %v623_v22 = vpop.f32.mrf.mxu1  ;;  %v535_v25 = vadd.f32 %v534_v21, %v2032_v30 }
 0x1c9   : > { %v895_v23 = vpop.f32.mrf.mxu2  ;;  %v624_v26 = vadd.f32 %v623_v22, %v2034_v31 }
 0x1ca   : > { %v984_v24 = vpop.f32.mrf.mxu3  ;;  %v896_v28 = vadd.f32 %v2089_v57, %v895_v23  ;;  %v690_v35 = vmax.f32 %v535_v25, 0.0 }
 0x1cb   : > { %v691_v39 = vmax.f32 %v624_v26, 0.0 }
 0x1cc   : > { %v985_v41 = vadd.f32 %v984_v24, %v896_v28 }
 0x1cf   : > { %v536_v27 = vpop.f32.mrf.mxu0 }
 0x1d0   : > { %v537_v29 = vadd.f32 %v536_v27, %v2032_v30  ;;  %v625_v32 = vpop.f32.mrf.mxu1 }
 0x1d1   : > { %v626_v33 = vadd.f32 %v625_v32, %v2034_v31  ;;  %v897_v34 = vpop.f32.mrf.mxu2 }
 0x1d2   : > { %v692_v36 = vmax.f32 %v537_v29, 0.0  ;;  %v898_v37 = vadd.f32 %v2089_v57, %v897_v34  ;;  %v986_v38 = vpop.f32.mrf.mxu3 }
 0x1d3   : > { %v693_v40 = vmax.f32 %v626_v33, 0.0 }
 0x1d4   : > { %v728_v42 = vpack.c.bf16 %v692_v36, %v690_v35  ;;  %v987_v43 = vadd.f32 %v986_v38, %v898_v37 }
 0x1d5   : > { %v729_v44 = vpack.c.bf16 %v693_v40, %v691_v39 }
 0x1d6   : > { %v1446_v45 = vpack.c.bf16 %v987_v43, %v985_v41  ;;  %939 = vmatmul.bf16.gmra.mxu2 %v728_v42 }
 0x1d7   : > { %1028 = vmatmul.bf16.gmra.mxu3 %v729_v44  ;;  %v539_v46 = vpop.f32.mrf.mxu0 }
 0x1d8   : > { %1506 = vst [vmem:[%s2098_s23 + $0x20] sm:$0xff] %v1446_v45   ;;  %v628_v47 = vpop.f32.mrf.mxu1  ;;  %v540_v50 = vadd.f32 %v539_v46, %v2032_v30 }
 0x1d9   : > { %v900_v48 = vpop.f32.mrf.mxu2  ;;  %v629_v51 = vadd.f32 %v628_v47, %v2034_v31 }
 0x1da   : > { %v989_v49 = vpop.f32.mrf.mxu3  ;;  %v901_v53 = vadd.f32 %v2089_v57, %v900_v48  ;;  %v694_v59 = vmax.f32 %v540_v50, 0.0 }
 0x1db   : > { %v695_v63 = vmax.f32 %v629_v51, 0.0 }
 0x1dc   : > { %v990_v1 = vadd.f32 %v989_v49, %v901_v53 }
 0x1df   : > { %v541_v52 = vpop.f32.mrf.mxu0 }
 0x1e0   : > { %v542_v54 = vadd.f32 %v541_v52, %v2032_v30  ;;  %v630_v55 = vpop.f32.mrf.mxu1 }
 0x1e1   : > { %v631_v56 = vadd.f32 %v630_v55, %v2034_v31  ;;  %v902_v58 = vpop.f32.mrf.mxu2 }
 0x1e2   : > { %v696_v60 = vmax.f32 %v542_v54, 0.0  ;;  %v903_v61 = vadd.f32 %v2089_v57, %v902_v58  ;;  %v991_v62 = vpop.f32.mrf.mxu3 }
 0x1e3   : > { %v697_v0 = vmax.f32 %v631_v56, 0.0 }
 0x1e4   : > { %v730_v2 = vpack.c.bf16 %v696_v60, %v694_v59  ;;  %v992_v3 = vadd.f32 %v991_v62, %v903_v61 }
 0x1e5   : > { %v731_v4 = vpack.c.bf16 %v697_v0, %v695_v63 }
 0x1e6   : > { %v1451_v5 = vpack.c.bf16 %v992_v3, %v990_v1  ;;  %944 = vmatmul.bf16.gmra.mxu2 %v730_v2 }
 0x1e7   : > { %1033 = vmatmul.bf16.gmra.mxu3 %v731_v4  ;;  %v544_v6 = vpop.f32.mrf.mxu0 }
 0x1e8   : > { %1507 = vst [vmem:[%s2098_s23 + $0x28] sm:$0xff] %v1451_v5   ;;  %v633_v7 = vpop.f32.mrf.mxu1  ;;  %v545_v10 = vadd.f32 %v544_v6, %v2032_v30 }
 0x1e9   : > { %v905_v8 = vpop.f32.mrf.mxu2  ;;  %v634_v11 = vadd.f32 %v633_v7, %v2034_v31 }
 0x1ea   : > { %v994_v9 = vpop.f32.mrf.mxu3  ;;  %v906_v13 = vadd.f32 %v2089_v57, %v905_v8  ;;  %v698_v18 = vmax.f32 %v545_v10, 0.0 }
 0x1eb   : > { %v699_v22 = vmax.f32 %v634_v11, 0.0 }
 0x1ec   : > { %v995_v24 = vadd.f32 %v994_v9, %v906_v13 }
 0x1ef   : > { %v546_v12 = vpop.f32.mrf.mxu0 }
 0x1f0   : > { %v547_v14 = vadd.f32 %v546_v12, %v2032_v30  ;;  %v635_v15 = vpop.f32.mrf.mxu1 }
 0x1f1   : > { %v636_v16 = vadd.f32 %v635_v15, %v2034_v31  ;;  %v907_v17 = vpop.f32.mrf.mxu2 }
 0x1f2   : > { %v700_v19 = vmax.f32 %v547_v14, 0.0  ;;  %v908_v20 = vadd.f32 %v2089_v57, %v907_v17  ;;  %v996_v21 = vpop.f32.mrf.mxu3 }
 0x1f3   : > { %v701_v23 = vmax.f32 %v636_v16, 0.0 }
 0x1f4   : > { %v732_v25 = vpack.c.bf16 %v700_v19, %v698_v18  ;;  %v997_v26 = vadd.f32 %v996_v21, %v908_v20 }
 0x1f5   : > { %v733_v27 = vpack.c.bf16 %v701_v23, %v699_v22 }
 0x1f6   : > { %v1456_v28 = vpack.c.bf16 %v997_v26, %v995_v24  ;;  %949 = vmatmul.bf16.gmra.mxu2 %v732_v25 }
 0x1f7   : > { %1038 = vmatmul.bf16.gmra.mxu3 %v733_v27 }
 0x1f8   : > { %1508 = vst [vmem:[%s2098_s23 + $0x30] sm:$0xff] %v1456_v28  }
 0x1f9   : > { %v910_v30 = vpop.f32.mrf.mxu2 }
 0x1fa   : > { %v999_v29 = vpop.f32.mrf.mxu3  ;;  %v911_v31 = vadd.f32 %v2089_v57, %v910_v30 }
 0x1fc   : > { %v1000_v35 = vadd.f32 %v999_v29, %v911_v31 }
 0x201   : > { %v912_v32 = vpop.f32.mrf.mxu2 }
 0x202   : > { %v913_v33 = vadd.f32 %v2089_v57, %v912_v32  ;;  %v1001_v34 = vpop.f32.mrf.mxu3 }
 0x204   : > { %v1002_v36 = vadd.f32 %v1001_v34, %v913_v33 }
 0x206   : > { %v1461_v37 = vpack.c.bf16 %v1002_v36, %v1000_v35 }
 0x208   : > { %1509 = vst [vmem:[%s2098_s23 + $0x38] sm:$0xff] %v1461_v37  }
 0x209   : > { %v915_v38 = vpop.f32.mrf.mxu2 }
 0x20a   : > { %v1004_v39 = vpop.f32.mrf.mxu3  ;;  %v916_v40 = vadd.f32 %v2089_v57, %v915_v38 }
 0x20c   : > { %v1005_v44 = vadd.f32 %v1004_v39, %v916_v40 }
 0x211   : > { %v917_v41 = vpop.f32.mrf.mxu2 }
 0x212   : > { %v918_v42 = vadd.f32 %v2089_v57, %v917_v41  ;;  %v1006_v43 = vpop.f32.mrf.mxu3 }
 0x214   : > { %v1007_v45 = vadd.f32 %v1006_v43, %v918_v42 }
 0x216   : > { %v1466_v46 = vpack.c.bf16 %v1007_v45, %v1005_v44 }
 0x218   : > { %1510 = vst [vmem:[%s2098_s23 + $0x40] sm:$0xff] %v1466_v46  }
 0x219   : > { %v920_v47 = vpop.f32.mrf.mxu2 }
 0x21a   : > { %v1009_v48 = vpop.f32.mrf.mxu3  ;;  %v921_v49 = vadd.f32 %v2089_v57, %v920_v47 }
 0x21c   : > { %v1010_v53 = vadd.f32 %v1009_v48, %v921_v49 }
 0x221   : > { %v922_v50 = vpop.f32.mrf.mxu2 }
 0x222   : > { %v923_v51 = vadd.f32 %v2089_v57, %v922_v50  ;;  %v1011_v52 = vpop.f32.mrf.mxu3 }
 0x224   : > { %v1012_v54 = vadd.f32 %v1011_v52, %v923_v51 }
 0x226   : > { %v1471_v55 = vpack.c.bf16 %v1012_v54, %v1010_v53 }
 0x228   : > { %1511 = vst [vmem:[%s2098_s23 + $0x48] sm:$0xff] %v1471_v55  }
 0x229   : > { %v925_v56 = vpop.f32.mrf.mxu2 }
 0x22a   : > { %v1014_v58 = vpop.f32.mrf.mxu3  ;;  %v926_v59 = vadd.f32 %v2089_v57, %v925_v56 }
 0x22c   : > { %v1015_v63 = vadd.f32 %v1014_v58, %v926_v59 }
 0x231   : > { %v927_v60 = vpop.f32.mrf.mxu2 }
 0x232   : > { %v928_v61 = vadd.f32 %v2089_v57, %v927_v60  ;;  %v1016_v62 = vpop.f32.mrf.mxu3 }
 0x234   : > { %v1017_v0 = vadd.f32 %v1016_v62, %v928_v61 }
 0x236   : > { %v1476_v1 = vpack.c.bf16 %v1017_v0, %v1015_v63 }
 0x238   : > { %1512 = vst [vmem:[%s2098_s23 + $0x50] sm:$0xff] %v1476_v1  }
 0x239   : > { %v930_v2 = vpop.f32.mrf.mxu2 }
 0x23a   : > { %v1019_v3 = vpop.f32.mrf.mxu3  ;;  %v931_v4 = vadd.f32 %v2089_v57, %v930_v2 }
 0x23c   : > { %v1020_v8 = vadd.f32 %v1019_v3, %v931_v4 }
 0x241   : > { %v932_v5 = vpop.f32.mrf.mxu2 }
 0x242   : > { %v933_v6 = vadd.f32 %v2089_v57, %v932_v5  ;;  %v1021_v7 = vpop.f32.mrf.mxu3 }
 0x244   : > { %v1022_v9 = vadd.f32 %v1021_v7, %v933_v6 }
 0x246   : > { %v1481_v10 = vpack.c.bf16 %v1022_v9, %v1020_v8 }
 0x248   : > { %1513 = vst [vmem:[%s2098_s23 + $0x58] sm:$0xff] %v1481_v10  }
 0x249   : > { %v935_v11 = vpop.f32.mrf.mxu2 }
 0x24a   : > { %v1024_v12 = vpop.f32.mrf.mxu3  ;;  %v936_v13 = vadd.f32 %v2089_v57, %v935_v11 }
 0x24c   : > { %v1025_v17 = vadd.f32 %v1024_v12, %v936_v13 }
 0x251   : > { %v937_v14 = vpop.f32.mrf.mxu2 }
 0x252   : > { %v938_v15 = vadd.f32 %v2089_v57, %v937_v14  ;;  %v1026_v16 = vpop.f32.mrf.mxu3 }
 0x254   : > { %v1027_v18 = vadd.f32 %v1026_v16, %v938_v15 }
 0x256   : > { %v1486_v19 = vpack.c.bf16 %v1027_v18, %v1025_v17 }
 0x258   : > { %1514 = vst [vmem:[%s2098_s23 + $0x60] sm:$0xff] %v1486_v19  }
 0x259   : > { %v940_v20 = vpop.f32.mrf.mxu2 }
 0x25a   : > { %v1029_v21 = vpop.f32.mrf.mxu3  ;;  %v941_v22 = vadd.f32 %v2089_v57, %v940_v20 }
 0x25c   : > { %v1030_v26 = vadd.f32 %v1029_v21, %v941_v22 }
 0x261   : > { %v942_v23 = vpop.f32.mrf.mxu2 }
 0x262   : > { %v943_v24 = vadd.f32 %v2089_v57, %v942_v23  ;;  %v1031_v25 = vpop.f32.mrf.mxu3 }
 0x264   : > { %v1032_v27 = vadd.f32 %v1031_v25, %v943_v24 }
 0x266   : > { %v1491_v28 = vpack.c.bf16 %v1032_v27, %v1030_v26 }
 0x268   : > { %1515 = vst [vmem:[%s2098_s23 + $0x68] sm:$0xff] %v1491_v28  }
 0x269   : > { %v945_v30 = vpop.f32.mrf.mxu2 }
 0x26a   : > { %v1034_v29 = vpop.f32.mrf.mxu3  ;;  %v946_v31 = vadd.f32 %v2089_v57, %v945_v30 }
 0x26c   : > { %v1035_v35 = vadd.f32 %v1034_v29, %v946_v31 }
 0x271   : > { %v947_v32 = vpop.f32.mrf.mxu2 }
 0x272   : > { %v948_v33 = vadd.f32 %v2089_v57, %v947_v32  ;;  %v1036_v34 = vpop.f32.mrf.mxu3 }
 0x274   : > { %v1037_v36 = vadd.f32 %v1036_v34, %v948_v33 }
 0x276   : > { %v1496_v37 = vpack.c.bf16 %v1037_v36, %v1035_v35 }
 0x278   : > { %1516 = vst [vmem:[%s2098_s23 + $0x70] sm:$0xff] %v1496_v37  }
 0x279   : > { %v950_v38 = vpop.f32.mrf.mxu2 }
 0x27a   : > { %v1039_v39 = vpop.f32.mrf.mxu3  ;;  %v951_v40 = vadd.f32 %v2089_v57, %v950_v38 }
 0x27c   : > { %v1040_v44 = vadd.f32 %v1039_v39, %v951_v40 }
 0x281   : > { %v952_v41 = vpop.f32.mrf.mxu2 }
 0x282   : > { %v953_v42 = vadd.f32 %v2089_v57, %v952_v41  ;;  %v1041_v43 = vpop.f32.mrf.mxu3 }
 0x284   : > { %v1042_v45 = vadd.f32 %v1041_v43, %v953_v42  ;;  %1115 = sbr.rel (!%p1908_p11) target bundleno = 680 (0x2a8), region = 60 }
 0x286   : > { %v1501_v46 = vpack.c.bf16 %v1042_v45, %v1040_v44 }
 0x288   : > { %1517 = vst [vmem:[%s2098_s23 + $0x78] sm:$0xff] %v1501_v46  }
 0x289   : > { %s2266_s15 = smov (!%p1118_p6, %s1117_s15), 32 }
 0x28a   : > { %s1382_s10 = sshll.u32 %s2266_s15, 2 }
 0x28b   : > { %s1121_s9 = ssub.s32 128, %s1382_s10 }
 0x28c   : > { %s1122_s11 = sshll.u32 %s1121_s9, 4 }
 0x28d   : > { %1123 = vsyncadd %s1109_s28, %s1122_s11  ;;  %p2179_p5 = scmp.ne.s32.totalorder %s1382_s10, 0  ;;  %s1422_s1 = sshll.u32 %s1877_s22, 7 }
 0x28e   : > { %s1126_s13 = scalar_lea.hbm %s2238_s5, %s1422_s1  ;;  %s1128_s25 = sshll.u32 %s2098_s23, 4  ;;  %s2188_s25 = int_to_ptr.vmem [resolvable:$true] %s1128_s25 }
 0x28f   : > { %s1130_s26 = sshll.u32 %s1126_s13, 4  ;;  %s1386_s8 = sshll.u32 %s2266_s15, 6  ;;  %s2190_s26 = int_to_ptr.hbm [resolvable:$true] %s1130_s26 }
 0x290   : > { %s1726_s29 = sshra.s32 %s2188_s25, 4  ;;  %s1728_s7 = sshrl.u32 %s1386_s8, 4  ;;  %s1727_s29 = int_to_ptr.vmem [resolvable:$true] %s1726_s29 }
 0x291   : > { %s1733_s17 = scalar_lea.vmem %s1727_s29, %s1728_s7  ;;  %s1823_s22 = smov [#allocation10]  }
 0x292   : > { %p1734_p11 = scmp.ne.s32.totalorder %s1727_s29, %s1733_s17  ;;  %s1737_s14 = scalar_lea.vmem %s1823_s22, 256 }
 0x293   : > { %p1739_p1 = scmp.lt.s32.totalorder %s1737_s14, %s1733_s17 }
 0x294   : > { %p1735_p9 = pnand %p1734_p11, %p2179_p5 }
 0x296   : > { %p1736_p10 = pneg %p1735_p9 }
 0x298   : > { %p1741_p0 = pnand %p1739_p1, %p1736_p10 }
 0x29a   : > { %1744 = shalt.err (!%p1741_p0)
}
 0x29b   : > { %s1745_s23 = sshra.s32 %s2190_s26, 4  ;;  %s1756_s1 = scalar_lea.hbm %s2238_s5, 152  ;;  %s1746_s23 = int_to_ptr.hbm [resolvable:$true] %s1745_s23 }
 0x29c   : > { %s1752_s10 = scalar_lea.hbm %s1746_s23, %s1728_s7  ;;  %p1757_p4 = scmp.lt.s32.totalorder %s1746_s23, %s2238_s5 }
 0x29d   : > { %p1753_p3 = scmp.ne.s32.totalorder %s1746_s23, %s1752_s10  ;;  %p1758_p12 = scmp.lt.s32.totalorder %s1756_s1, %s1752_s10 }
 0x29f   : > { %p1754_p7 = pnand %p1753_p3, %p2179_p5  ;;  %p1759_p13 = por %p1758_p12, %p1757_p4 }
 0x2a1   : > { %p1755_p8 = pneg %p1754_p7 }
 0x2a3   : > { %p1760_p2 = pnand %p1759_p13, %p1755_p8 }
 0x2a5   : > { %1763 = shalt.err (!%p1760_p2)
}
 0x2a6   : > { %s1824_s13 = smov 64   ;;  %s1825_s29 = smov 4  }
 0x2a7   : > { %1136 = dma.vmem_to_hbm [thread:$0]  (%p2179_p5), %s2188_s25, %s1386_s8, %s2190_s26, %s1109_s28, %s1824_s13, %s1824_s13, %s1825_s29  }
 0x2a8 PF: > { %s1145_s7 = sand.u32 1, %s1799_s18   ;;  %p2257_p6 = scmp.ne.s32.totalorder %s2246_s6, 0 }
 0x2a9   : > { %p2258_p11 = scmp.ge.s32.totalorder %s1811_s21, 2  ;;  %s1146_s17 = scalar_lea.sflag [#allocation4], %s1145_s7 }
 0x2ab   : > { %p1543_p9 = pnand %p2258_p11, %p2257_p6 }
 0x2ad   : > { %p1544_p10 = pneg %p1543_p9 }
 0x2af   : > { %1794 = dma.done.wait (%p1544_p10), %s1146_s17, 2048  }
 0x2b0   : > { %1796 = vsyncadd (%p1544_p10), %s1146_s17, 4294965248  ;;  %p20_p1 = scmp.ge.s32.totalorder %s1881_s24, 4   ;;  %s2259_s18 = smov %s1803_s19 }
 0x2b1   : > { %s2260_s19 = smov %s1807_s20  ;;  %s2261_s20 = smov %s1893_s27 }
 0x2b2   : > { %s2262_s21 = smov %s1881_s24  ;;  %22 = sbr.rel (!%p20_p1) target bundleno = 10 (0xa), region = 97 }
 0x2b7   :  { %1152 = vsyncpa [#allocation3], 1 }
 0x2b8   :  { %1154 = vsyncpa [#allocation3 + $0x1], 1 }
 0x2b9   :  { %1155 = vsyncpa [#allocation6], 1 }
 0x2ba   :  { %1156 = vsyncpa [#allocation9], 1 }
 0x2bb   :  { %1157 = vsyncpa [#allocation4], 1 }
 0x2bc   :  { %1159 = vsyncpa [#allocation4 + $0x1], 1 }

// kernel: _mlp_forward_impl.1
= control target key start
LH: loop header
LB: loop body
LE: loop exit
PB: predicated region body
PF: predicated region fallthrough
CT: control target
= control target key end

     0   :  { %s2233_s0 = inlined_call_operand.hbm [shape: f32[300,128], index: 0, kind: input, shape index: {}]   ;;  %s2234_s1 = inlined_call_operand.hbm [shape: bf16[128,256], index: 1, kind: input, shape index: {}]   ;;  %s2235_s2 = inlined_call_operand.hbm [shape: f32[1,256], index: 2, kind: input, shape index: {}]   ;;  %s2236_s3 = inlined_call_operand.hbm [shape: bf16[256,128], index: 3, kind: input, shape index: {}]   ;;  %s2237_s4 = inlined_call_operand.vmem [shape: f32[1,128], index: 4, kind: input, shape index: {}]   ;;  %s2238_s5 = inlined_call_operand.hbm [shape: bf16[300,128], index: 5, kind: output, shape index: {}]  }
   0x1   :  { %2241 = sst [smem:[#allocation15_spill]] %s2234_s1 }
   0x2   :  { %2242 = sst [smem:[#allocation16_spill]] %s2235_s2 }
   0x3   :  { %10 = vsyncpa [#allocation3], 0 }
   0x4   :  { %12 = vsyncpa [#allocation3 + $0x1], 0 }
   0x5   :  { %13 = vsyncpa [#allocation6], 0 }
   0x6   :  { %14 = vsyncpa [#allocation9], 0 }
   0x7   :  { %15 = vsyncpa [#allocation4], 0 }
   0x8   :  { %17 = vsyncpa [#allocation4 + $0x1], 0  ;;  %s1856_s18 = smov 0   ;;  %s1858_s19 = smov 0  }
   0x9   :  { %s1860_s20 = smov 0   ;;  %s1862_s21 = smov 0  }
   0xa LB: > { %s1877_s22 = sadd.s32 4294967295, %s1811_s21   ;;  %s1233_s23 = sadd.s32 4294967294, %s1811_s21   ;;  %s1811_s21 = sphi %s1862_s21, %s2262_s21   ;;  %s1807_s20 = sphi %s1860_s20, %s2261_s20   ;;  %s1803_s19 = sphi %s1858_s19, %s2260_s19   ;;  %s1799_s18 = sphi %s1856_s18, %s2259_s18  }
   0xb   : > { %s1881_s24 = sadd.s32 1, %s1811_s21   ;;  %s30_s25 = sadd.s32 1, %s1807_s20 }
   0xc   : > { %s27_s26 = ssub.s32 %s1811_s21, %s1881_s24  ;;  %p37_p0 = scmp.ne.s32.totalorder %s1807_s20, %s1803_s19 }
   0xd   : > { %p28_p1 = scmp.eq.s32.totalorder %s27_s26, 0  ;;  %p38_p2 = scmp.eq.s32.totalorder %s1811_s21, 0 }
   0xe   : > { %p43_p3 = scmp.ne.s32.totalorder %s1803_s19, %s1799_s18  ;;  %p2240_p4 = scmp.eq.s32.totalorder %s1877_s22, 0 }
   0xf   : > { %s1893_s27 = scalar_select %p28_p1, %s1807_s20, %s30_s25  }
  0x10   : > { %p1895_p5 = por %p38_p2, %p37_p0  ;;  %p1901_p6 = por %p2240_p4, %p43_p3 }
  0x11   : > { %p151_p7 = scmp.eq.s32.totalorder %s1877_s22, 1  ;;  %p157_p8 = scmp.eq.s32.totalorder %s1233_s23, 1 }
  0x12   : > { %p1234_p9 = scmp.ge.s32.totalorder %s1811_s21, 1  ;;  %p164_p10 = scmp.lt.s32.totalorder %s1811_s21, 3 }
  0x13   : > { %p1908_p11 = por %p151_p7, %p37_p0  ;;  %p1912_p12 = por %p157_p8, %p43_p3 }
  0x14   : > { %p1916_p13 = pnand %p1234_p9, %p164_p10  ;;  %s2248_s1 = sld [smem:[#allocation15_spill]] }
  0x15   : > { %s2246_s6 = scalar_select %p1912_p12, 1, 0 }
  0x16   : > { %p1532_p1 = pneg %p1916_p13  ;;  %s1813_s11 = smov [#allocation5]  }
  0x17   : > { %s177_s12 = sshll.u32 %s1813_s11, 4  ;;  %s2250_s2 = sld [smem:[#allocation16_spill]]  ;;  %s178_s12 = int_to_ptr.vmem [resolvable:$true] %s177_s12 }
  0x18   : > { %p1927_p0 = pnand %p1532_p1, %p2240_p4  ;;  %s1814_s17 = smov 128  }
  0x19   : > { %s1815_s23 = smov 8   ;;  %s201_s8 = sshll.u32 %s2236_s3, 4  ;;  %s202_s8 = int_to_ptr.hbm [resolvable:$true] %s201_s8 }
  0x1a   : > { %s175_s10 = sshll.u32 %s2248_s1, 4  ;;  %s1816_s9 = smov [#allocation7]   ;;  %s176_s10 = int_to_ptr.hbm [resolvable:$true] %s175_s10 }
  0x1b   : > { %1535 = dma.hbm_to_vmem [thread:$0]  (!%p1927_p0), %s176_s10, 2048, %s178_s12, [#allocation6], %s1814_s17, %s1814_s17, %s1815_s23  }
  0x1c   : > { %s192_s11 = sshll.u32 %s1816_s9, 4  ;;  %s1817_s14 = smov [#allocation8]   ;;  %s193_s11 = int_to_ptr.vmem [resolvable:$true] %s192_s11 }
  0x1d   : > { %s190_s16 = sshll.u32 %s2250_s2, 4  ;;  %s203_s15 = sshll.u32 %s1817_s14, 4  ;;  %s191_s16 = int_to_ptr.hbm [resolvable:$true] %s190_s16  ;;  %s204_s15 = int_to_ptr.vmem [resolvable:$true] %s203_s15 }
  0x1e   : > { %1538 = dma.hbm_to_vmem [thread:$0]  (!%p1927_p0), %s191_s16, 32, %s193_s11, [#allocation6]  }
  0x1f   : > { %s1818_s1 = smov 64   ;;  %s1819_s2 = smov 4  }
  0x20   : > { %1541 = dma.hbm_to_vmem [thread:$0]  (!%p1927_p0), %s202_s8, 2048, %s204_s15, [#allocation9], %s1818_s1, %s1818_s1, %s1819_s2  }
  0x21   : > { %p2239_p2 = scmp.ge.s32.totalorder %s1811_s21, 2 }
  0x23   : > { %216 = sbr.rel (%p2239_p2) target bundleno = 76 (0x4c), region = 32 }
  0x28   : > { %219 = sbr.rel (!%p1895_p5) target bundleno = 76 (0x4c), region = 36  ;;  %s220_s10 = sand.u32 (%p1895_p5), 1, %s1807_s20  }
  0x29   : > { %s1240_s12 = sshll.u32 (%p1895_p5), %s1811_s21, 5  ;;  %s1239_s16 = sshll.u32 (%p1895_p5), %s220_s10, 8 }
  0x2a   : > { %s226_s17 = ssub.s32 (%p1895_p5), 38, %s1240_s12  ;;  %s1953_s23 = scalar_lea.sflag (%p1895_p5), [#allocation3], %s220_s10 }
  0x2b   : > { %p227_p3 = scmp.lt.s32.totalorder (%p1895_p5), %s226_s17, 32  ;;  %s224_s25 = scalar_lea.vmem (%p1895_p5), [#allocation2], %s1239_s16 }
  0x2d   : > { %s2264_s17 = smov (!%p227_p3, %s226_s17), 32 }
  0x2e   : > { %s1241_s13 = sshll.u32 %s2264_s17, 3 }
  0x2f   : > { %s230_s1 = ssub.s32 256, %s1241_s13 }
  0x30   : > { %s231_s2 = sshll.u32 %s230_s1, 4 }
  0x31   : > { %232 = vsyncadd %s1953_s23, %s231_s2  ;;  %p1956_p5 = scmp.ne.s32.totalorder %s1241_s13, 0  ;;  %s1389_s26 = sshll.u32 %s1811_s21, 8 }
  0x32   : > { %s235_s11 = scalar_lea.hbm %s2233_s0, %s1389_s26  ;;  %s1964_s14 = sshll.u32 %s224_s25, 4  ;;  %s240_s14 = int_to_ptr.vmem [resolvable:$true] %s1964_s14 }
  0x33   : > { %s237_s15 = sshll.u32 %s235_s11, 4  ;;  %s1245_s10 = sshll.u32 %s2264_s17, 7  ;;  %s1967_s15 = int_to_ptr.hbm [resolvable:$true] %s237_s15 }
  0x34   : > { %s1687_s12 = sshra.s32 %s1967_s15, 4  ;;  %s1689_s16 = sshrl.u32 %s1245_s10, 4  ;;  %s1688_s12 = int_to_ptr.hbm [resolvable:$true] %s1687_s12 }
  0x35   : > { %s1694_s13 = scalar_lea.hbm %s1688_s12, %s1689_s16  ;;  %s1698_s25 = scalar_lea.hbm %s2233_s0, 304 }
  0x36   : > { %p1695_p7 = scmp.ne.s32.totalorder %s1688_s12, %s1694_s13  ;;  %p1699_p10 = scmp.lt.s32.totalorder %s1688_s12, %s2233_s0 }
  0x37   : > { %p1700_p1 = scmp.lt.s32.totalorder %s1698_s25, %s1694_s13 }
  0x38   : > { %p1696_p8 = pnand %p1695_p7, %p1956_p5 }
  0x39   : > { %p1701_p0 = por %p1700_p1, %p1699_p10 }
  0x3a   : > { %p1697_p9 = pneg %p1696_p8 }
  0x3c   : > { %p1702_p3 = pnand %p1701_p0, %p1697_p9 }
  0x3e   : > { %1705 = shalt.err (!%p1702_p3)
}
  0x3f   : > { %s1706_s9 = sshra.s32 %s240_s14, 4  ;;  %s1820_s1 = smov [#allocation2]   ;;  %s1707_s9 = int_to_ptr.vmem [resolvable:$true] %s1706_s9 }
  0x40   : > { %s1713_s11 = scalar_lea.vmem %s1707_s9, %s1689_s16  ;;  %s1717_s2 = scalar_lea.vmem %s1820_s1, 512 }
  0x41   : > { %p1714_p7 = scmp.ne.s32.totalorder %s1707_s9, %s1713_s11  ;;  %p1719_p4 = scmp.lt.s32.totalorder %s1717_s2, %s1713_s11 }
  0x43   : > { %p1715_p8 = pnand %p1714_p7, %p1956_p5 }
  0x45   : > { %p1716_p2 = pneg %p1715_p8 }
  0x47   : > { %p1721_p12 = pnand %p1719_p4, %p1716_p2 }
  0x49   : > { %1724 = shalt.err (!%p1721_p12)
}
  0x4a   : > { %s1821_s12 = smov 128   ;;  %s1822_s13 = smov 8  }
  0x4b   : > { %245 = dma.hbm_to_vmem [thread:$0]  (%p1956_p5), %s1967_s15, %s1245_s10, %s240_s14, %s1953_s23, %s1821_s12, %s1821_s12, %s1822_s13  }
  0x4c PF: > { %251 = sbr.rel (%p1916_p13) target bundleno = 680 (0x2a8), region = 40  ;;  %s1996_s16 = sand.u32 (!%p1916_p13), 1, %s1803_s19  }
  0x4d   : > { %s1247_s25 = sshll.u32 (!%p1916_p13), %s1996_s16, 8  ;;  %s254_s26 = scalar_lea.sflag (!%p1916_p13), [#allocation3], %s1996_s16 }
  0x4e   : > { %s2000_s8 = scalar_lea.vmem (!%p1916_p13), [#allocation2], %s1247_s25 }
  0x51   : > { %1782 = dma.done.wait (%p1901_p6), %s254_s26, 4096  }
  0x52   : > { %1784 = vsyncadd (%p1901_p6), %s254_s26, 4294963200  ;;  %p2252_p4 = scmp.eq.s32.totalorder %s1877_s22, 0 }
  0x54   : > { %1786 = dma.done.wait (%p2252_p4), [#allocation6], 2080   ;;  %p2253_p12 = pmov %p2252_p4 }
  0x55   : > { %p2254_p13 = pmov %p2252_p4 }
  0x56   : > { %1788 = vsyncadd (%p2253_p12), [#allocation6], 4294965216 }
  0x57   : > { %1790 = dma.done.wait (%p2254_p13), [#allocation9], 2048   ;;  %p2255_p2 = pmov %p2252_p4 }
  0x58   : > { %v1310_v0 = vld [vmem:[#allocation5 + $0x70] sm:$0xf]  ;;  %v1405_v1 = vld [vmem:[#allocation5 + $0x74] sm:$0xf0]  ;;  %v1404_v2 = vld [vmem:[#allocation5 + $0x74] sm:$0xf] }
  0x59   : > { %1792 = vsyncadd (%p2255_p2), [#allocation9], 4294965248  ;;  %v1311_v3 = vor.u32 %v1405_v1, %v1310_v0  ;;  %v1312_v4 = vld [vmem:[#allocation5 + $0x78] sm:$0xf0]  ;;  %v1302_v5 = vld [vmem:[#allocation5 + $0x60] sm:$0xf] }
  0x5a   : > { %v1403_v6 = vld [vmem:[#allocation5 + $0x64] sm:$0xf0]  ;;  %v1315_v7 = vor.u32 %v1404_v2, %v1312_v4  ;;  %v1402_v8 = vld [vmem:[#allocation5 + $0x64] sm:$0xf]  ;;  %v1304_v9 = vld [vmem:[#allocation5 + $0x68] sm:$0xf0] }
  0x5b   : > { %460 = vmatpush.bf16.msra.mxu0 %v1311_v3  ;;  %v1303_v10 = vor.u32 %v1403_v6, %v1302_v5  ;;  %v1307_v11 = vor.u32 %v1402_v8, %v1304_v9  ;;  %v1294_v12 = vld [vmem:[#allocation5 + $0x50] sm:$0xf]  ;;  %v1401_v13 = vld [vmem:[#allocation5 + $0x54] sm:$0xf0]  ;;  %v1400_v14 = vld [vmem:[#allocation5 + $0x54] sm:$0xf] }
  0x5c   : > { %549 = vmatpush.bf16.msra.mxu1 %v1315_v7  ;;  %v1296_v15 = vld [vmem:[#allocation5 + $0x58] sm:$0xf0]  ;;  %v1295_v16 = vor.u32 %v1401_v13, %v1294_v12  ;;  %v1286_v18 = vld [vmem:[#allocation5 + $0x40] sm:$0xf]  ;;  %v1399_v19 = vld [vmem:[#allocation5 + $0x44] sm:$0xf0] }
  0x5d   : > { %v1299_v17 = vor.u32 %v1400_v14, %v1296_v15  ;;  %v1398_v20 = vld [vmem:[#allocation5 + $0x44] sm:$0xf]  ;;  %v1288_v21 = vld [vmem:[#allocation5 + $0x48] sm:$0xf0]  ;;  %v1287_v22 = vor.u32 %v1399_v19, %v1286_v18  ;;  %v1278_v24 = vld [vmem:[#allocation5 + $0x30] sm:$0xf] }
  0x5e   : > { %v1291_v23 = vor.u32 %v1398_v20, %v1288_v21  ;;  %v1397_v25 = vld [vmem:[#allocation5 + $0x34] sm:$0xf0]  ;;  %v1396_v26 = vld [vmem:[#allocation5 + $0x34] sm:$0xf]  ;;  %v1280_v27 = vld [vmem:[#allocation5 + $0x38] sm:$0xf0] }
  0x5f   : > { %461 = vmatpush.bf16.msra.mxu0 %v1303_v10  ;;  %v1279_v28 = vor.u32 %v1397_v25, %v1278_v24  ;;  %v1283_v29 = vor.u32 %v1396_v26, %v1280_v27  ;;  %v1270_v30 = vld [vmem:[#allocation5 + $0x20] sm:$0xf]  ;;  %v1395_v31 = vld [vmem:[#allocation5 + $0x24] sm:$0xf0]  ;;  %v1394_v32 = vld [vmem:[#allocation5 + $0x24] sm:$0xf] }
  0x60   : > { %550 = vmatpush.bf16.msra.mxu1 %v1307_v11  ;;  %v1272_v33 = vld [vmem:[#allocation5 + $0x28] sm:$0xf0]  ;;  %v1271_v34 = vor.u32 %v1395_v31, %v1270_v30  ;;  %v1262_v36 = vld [vmem:[#allocation5 + $0x10] sm:$0xf]  ;;  %v1393_v37 = vld [vmem:[#allocation5 + $0x14] sm:$0xf0] }
  0x61   : > { %v1275_v35 = vor.u32 %v1394_v32, %v1272_v33  ;;  %v1392_v38 = vld [vmem:[#allocation5 + $0x14] sm:$0xf]  ;;  %v1264_v39 = vld [vmem:[#allocation5 + $0x18] sm:$0xf0]  ;;  %v1263_v40 = vor.u32 %v1393_v37, %v1262_v36  ;;  %v1254_v42 = vld [vmem:[#allocation5] sm:$0xf] }
  0x62   : > { %v1267_v41 = vor.u32 %v1392_v38, %v1264_v39  ;;  %v1391_v43 = vld [vmem:[#allocation5 + $0x4] sm:$0xf0]  ;;  %v1390_v44 = vld [vmem:[#allocation5 + $0x4] sm:$0xf]  ;;  %v1256_v45 = vld [vmem:[#allocation5 + $0x8] sm:$0xf0] }
  0x63   : > { %462 = vmatpush.bf16.msra.mxu0 %v1295_v16  ;;  %v1255_v46 = vor.u32 %v1391_v43, %v1254_v42  ;;  %v310_v47 = vld [vmem:[%s2000_s8] sm:$0xff]  ;;  %v311_v48 = vld [vmem:[%s2000_s8 + $0x8] sm:$0xff]  ;;  %v1259_v49 = vor.u32 %v1390_v44, %v1256_v45  ;;  %v312_v51 = vld [vmem:[%s2000_s8 + $0x10] sm:$0xff]  ;;  %s1251_s17 = sshll.u32 %s1996_s16, 7  ;;  %s1109_s28 = scalar_lea.sflag [#allocation4], %s1996_s16 }
  0x64   : > { %551 = vmatpush.bf16.msra.mxu1 %v1299_v17  ;;  %v342_v50 = vpack.c.bf16 %v311_v48, %v310_v47  ;;  %v313_v52 = vld [vmem:[%s2000_s8 + $0x18] sm:$0xff]  ;;  %v314_v54 = vld [vmem:[%s2000_s8 + $0x20] sm:$0xff]  ;;  %v315_v55 = vld [vmem:[%s2000_s8 + $0x28] sm:$0xff]  ;;  %s2098_s23 = scalar_lea.vmem [#allocation10], %s1251_s17  ;;  %s1381_s14 = sshll.u32 (%p1908_p11), %s1877_s22, 5 }
  0x65   : > { %v343_v53 = vpack.c.bf16 %v313_v52, %v312_v51  ;;  %v344_v56 = vpack.c.bf16 %v315_v55, %v314_v54  ;;  %v316_v57 = vld [vmem:[%s2000_s8 + $0x30] sm:$0xff]  ;;  %v317_v58 = vld [vmem:[%s2000_s8 + $0x38] sm:$0xff]  ;;  %v318_v60 = vld [vmem:[%s2000_s8 + $0x40] sm:$0xff]  ;;  %s1117_s15 = ssub.s32 (%p1908_p11), 38, %s1381_s14 }
  0x66   : > { %v345_v59 = vpack.c.bf16 %v317_v58, %v316_v57  ;;  %v319_v61 = vld [vmem:[%s2000_s8 + $0x48] sm:$0xff]  ;;  %v1413_v63 = vld [vmem:[#allocation8 + $0x38] sm:$0xff]  ;;  %v320_v1 = vld [vmem:[%s2000_s8 + $0x50] sm:$0xff]  ;;  %p1118_p6 = scmp.lt.s32.totalorder (%p1908_p11), %s1117_s15, 32 }
  0x67   : > { %463 = vmatpush.bf16.msra.mxu0 %v1287_v22  ;;  %v346_v62 = vpack.c.bf16 %v319_v61, %v318_v60  ;;  %v1421_v0 = vld [vmem:[#allocation8 + $0x78] sm:$0xff]  ;;  %866 = vmatpush.bf16.msra.mxu2 %v1413_v63  ;;  %v1412_v4 = vld [vmem:[#allocation8 + $0x30] sm:$0xff]  ;;  %v1411_v6 = vld [vmem:[#allocation8 + $0x28] sm:$0xff] }
  0x68   : > { %552 = vmatpush.bf16.msra.mxu1 %v1291_v23  ;;  %955 = vmatpush.bf16.msra.mxu3 %v1421_v0  ;;  %v321_v2 = vld [vmem:[%s2000_s8 + $0x58] sm:$0xff]  ;;  %v1419_v7 = vld [vmem:[#allocation8 + $0x68] sm:$0xff]  ;;  %v1410_v8 = vld [vmem:[#allocation8 + $0x20] sm:$0xff] }
  0x69   : > { %v347_v3 = vpack.c.bf16 %v321_v2, %v320_v1  ;;  %v1420_v5 = vld [vmem:[#allocation8 + $0x70] sm:$0xff]  ;;  %v1418_v9 = vld [vmem:[#allocation8 + $0x60] sm:$0xff]  ;;  %v1409_v13 = vld [vmem:[#allocation8 + $0x18] sm:$0xff] }
  0x6a   : > { %v322_v10 = vld [vmem:[%s2000_s8 + $0x60] sm:$0xff]  ;;  %v323_v11 = vld [vmem:[%s2000_s8 + $0x68] sm:$0xff]  ;;  %v1408_v15 = vld [vmem:[#allocation8 + $0x10] sm:$0xff] }
  0x6b   : > { %464 = vmatpush.bf16.msra.mxu0 %v1279_v28  ;;  %867 = vmatpush.bf16.msra.mxu2 %v1412_v4  ;;  %v348_v12 = vpack.c.bf16 %v323_v11, %v322_v10  ;;  %v1417_v14 = vld [vmem:[#allocation8 + $0x58] sm:$0xff]  ;;  %v1416_v16 = vld [vmem:[#allocation8 + $0x50] sm:$0xff]  ;;  %v1407_v17 = vld [vmem:[#allocation8 + $0x8] sm:$0xff] }
  0x6c   : > { %553 = vmatpush.bf16.msra.mxu1 %v1283_v29  ;;  %956 = vmatpush.bf16.msra.mxu3 %v1420_v5  ;;  %v1415_v18 = vld [vmem:[#allocation8 + $0x48] sm:$0xff]  ;;  %v1406_v19 = vld [vmem:[#allocation8] sm:$0xff]  ;;  %v325_v22 = vld [vmem:[%s2000_s8 + $0x78] sm:$0xff] }
  0x6d   : > { %v1414_v20 = vld [vmem:[#allocation8 + $0x40] sm:$0xff]  ;;  %v324_v21 = vld [vmem:[%s2000_s8 + $0x70] sm:$0xff]  ;;  %v374_v27 = vld [vmem:[#allocation7] sm:$0x3] }
  0x6e   : > { %v349_v23 = vpack.c.bf16 %v325_v22, %v324_v21  ;;  %v326_v24 = vld [vmem:[%s2000_s8 + $0x80] sm:$0xff]  ;;  %v327_v25 = vld [vmem:[%s2000_s8 + $0x88] sm:$0xff]  ;;  %v2032_v30 = vperm.slane %v374_v27, 0  ;;  %v2034_v31 = vperm.slane %v374_v27, 1  ;;  %v328_v42 = vld [vmem:[%s2000_s8 + $0x90] sm:$0xff] }
  0x6f   : > { %465 = vmatpush.bf16.msra.mxu0 %v1271_v34  ;;  %868 = vmatpush.bf16.msra.mxu2 %v1411_v6  ;;  %v350_v26 = vpack.c.bf16 %v327_v25, %v326_v24  ;;  %v329_v43 = vld [vmem:[%s2000_s8 + $0x98] sm:$0xff]  ;;  %v331_v60 = vld [vmem:[%s2000_s8 + $0xa8] sm:$0xff] }
  0x70   : > { %554 = vmatpush.bf16.msra.mxu1 %v1275_v35  ;;  %957 = vmatpush.bf16.msra.mxu3 %v1419_v7 }
  0x73   : > { %466 = vmatpush.bf16.msra.mxu0 %v1263_v40  ;;  %869 = vmatpush.bf16.msra.mxu2 %v1410_v8 }
  0x74   : > { %555 = vmatpush.bf16.msra.mxu1 %v1267_v41  ;;  %958 = vmatpush.bf16.msra.mxu3 %v1418_v9 }
  0x77   : > { %467 = vmatpush.bf16.msra.mxu0 %v1255_v46  ;;  %870 = vmatpush.bf16.msra.mxu2 %v1409_v13  ;;  %v351_v46 = vpack.c.bf16 %v329_v43, %v328_v42  ;;  %v333_v13 = vld [vmem:[%s2000_s8 + $0xb8] sm:$0xff] }
  0x78   : > { %556 = vmatpush.bf16.msra.mxu1 %v1259_v49  ;;  %959 = vmatpush.bf16.msra.mxu3 %v1417_v14 }
  0x7a   : > { %468 = vmatmul.bf16.vlgmr.msra.gmra.mxu0 %v342_v50 }
  0x7b   : > { %557 = vmatmul.bf16.vlgmr.msra.gmra.mxu1 %v342_v50  ;;  %871 = vmatpush.bf16.msra.mxu2 %v1408_v15 }
  0x7c   : > { %960 = vmatpush.bf16.msra.mxu3 %v1416_v16 }
  0x7f   : > { %872 = vmatpush.bf16.msra.mxu2 %v1407_v17 }
  0x80   : > { %961 = vmatpush.bf16.msra.mxu3 %v1415_v18 }
  0x83   : > { %873 = vmatpush.bf16.msra.mxu2 %v1406_v19 }
  0x84   : > { %962 = vmatpush.bf16.msra.mxu3 %v1414_v20 }
  0x8a   : > { %473 = vmatmul.bf16.gmra.mxu0 %v343_v53 }
  0x8b   : > { %562 = vmatmul.bf16.gmra.mxu1 %v343_v53 }
  0x9a   : > { %478 = vmatmul.bf16.gmra.mxu0 %v344_v56 }
  0x9b   : > { %567 = vmatmul.bf16.gmra.mxu1 %v344_v56 }
  0xaa   : > { %483 = vmatmul.bf16.gmra.mxu0 %v345_v59 }
  0xab   : > { %572 = vmatmul.bf16.gmra.mxu1 %v345_v59  ;;  %v330_v59 = vld [vmem:[%s2000_s8 + $0xa0] sm:$0xff] }
  0xac   : > { %v352_v63 = vpack.c.bf16 %v331_v60, %v330_v59 }
  0xba   : > { %488 = vmatmul.bf16.gmra.mxu0 %v346_v62 }
  0xbb   : > { %577 = vmatmul.bf16.gmra.mxu1 %v346_v62 }
  0xca   : > { %493 = vmatmul.bf16.gmra.mxu0 %v347_v3 }
  0xcb   : > { %582 = vmatmul.bf16.gmra.mxu1 %v347_v3 }
  0xda   : > { %498 = vmatmul.bf16.gmra.mxu0 %v348_v12 }
  0xdb   : > { %587 = vmatmul.bf16.gmra.mxu1 %v348_v12  ;;  %v332_v12 = vld [vmem:[%s2000_s8 + $0xb0] sm:$0xff] }
  0xdc   : > { %v353_v16 = vpack.c.bf16 %v333_v13, %v332_v12 }
  0xea   : > { %503 = vmatmul.bf16.gmra.mxu0 %v349_v23 }
  0xeb   : > { %592 = vmatmul.bf16.gmra.mxu1 %v349_v23 }
  0xf7   : > { %v469_v28 = vpop.f32.mrf.mxu0 }
  0xf8   : > { %v558_v29 = vpop.f32.mrf.mxu1  ;;  %v470_v32 = vadd.f32 %v469_v28, %v2032_v30 }
  0xf9   : > { %v559_v33 = vadd.f32 %v558_v29, %v2034_v31  ;;  %v334_v29 = vld [vmem:[%s2000_s8 + $0xc0] sm:$0xff] }
  0xfa   : > { %508 = vmatmul.bf16.gmra.mxu0 %v350_v26  ;;  %v638_v38 = vmax.f32 %v470_v32, 0.0  ;;  %v335_v32 = vld [vmem:[%s2000_s8 + $0xc8] sm:$0xff] }
  0xfb   : > { %597 = vmatmul.bf16.gmra.mxu1 %v350_v26  ;;  %v639_v40 = vmax.f32 %v559_v33, 0.0 }
  0xff   : > { %v471_v34 = vpop.f32.mrf.mxu0 }
 0x100   : > { %v472_v35 = vadd.f32 %v471_v34, %v2032_v30  ;;  %v560_v36 = vpop.f32.mrf.mxu1 }
 0x101   : > { %v561_v37 = vadd.f32 %v560_v36, %v2034_v31 }
 0x102   : > { %v640_v39 = vmax.f32 %v472_v35, 0.0  ;;  %v354_v35 = vpack.c.bf16 %v335_v32, %v334_v29 }
 0x103   : > { %v641_v41 = vmax.f32 %v561_v37, 0.0 }
 0x104   : > { %v702_v44 = vpack.c.bf16 %v640_v39, %v638_v38 }
 0x105   : > { %v703_v45 = vpack.c.bf16 %v641_v41, %v639_v40 }
 0x106   : > { %874 = vmatmul.bf16.vlgmr.msra.gmra.mxu2 %v702_v44 }
 0x107   : > { %963 = vmatmul.bf16.vlgmr.msra.gmra.mxu3 %v703_v45  ;;  %v474_v47 = vpop.f32.mrf.mxu0 }
 0x108   : > { %v563_v48 = vpop.f32.mrf.mxu1  ;;  %v475_v49 = vadd.f32 %v474_v47, %v2032_v30 }
 0x109   : > { %v564_v50 = vadd.f32 %v563_v48, %v2034_v31  ;;  %v336_v48 = vld [vmem:[%s2000_s8 + $0xd0] sm:$0xff] }
 0x10a   : > { %513 = vmatmul.bf16.gmra.mxu0 %v351_v46  ;;  %v642_v55 = vmax.f32 %v475_v49, 0.0  ;;  %v337_v49 = vld [vmem:[%s2000_s8 + $0xd8] sm:$0xff] }
 0x10b   : > { %602 = vmatmul.bf16.gmra.mxu1 %v351_v46  ;;  %v643_v57 = vmax.f32 %v564_v50, 0.0 }
 0x10f   : > { %v476_v51 = vpop.f32.mrf.mxu0 }
 0x110   : > { %v477_v52 = vadd.f32 %v476_v51, %v2032_v30  ;;  %v565_v53 = vpop.f32.mrf.mxu1 }
 0x111   : > { %v566_v54 = vadd.f32 %v565_v53, %v2034_v31 }
 0x112   : > { %v644_v56 = vmax.f32 %v477_v52, 0.0  ;;  %v355_v52 = vpack.c.bf16 %v337_v49, %v336_v48 }
 0x113   : > { %v645_v58 = vmax.f32 %v566_v54, 0.0 }
 0x114   : > { %v704_v61 = vpack.c.bf16 %v644_v56, %v642_v55 }
 0x115   : > { %v705_v62 = vpack.c.bf16 %v645_v58, %v643_v57 }
 0x116   : > { %879 = vmatmul.bf16.gmra.mxu2 %v704_v61 }
 0x117   : > { %968 = vmatmul.bf16.gmra.mxu3 %v705_v62  ;;  %v479_v0 = vpop.f32.mrf.mxu0 }
 0x118   : > { %v568_v1 = vpop.f32.mrf.mxu1  ;;  %v480_v2 = vadd.f32 %v479_v0, %v2032_v30 }
 0x119   : > { %v569_v3 = vadd.f32 %v568_v1, %v2034_v31  ;;  %v338_v1 = vld [vmem:[%s2000_s8 + $0xe0] sm:$0xff] }
 0x11a   : > { %518 = vmatmul.bf16.gmra.mxu0 %v352_v63  ;;  %v646_v8 = vmax.f32 %v480_v2, 0.0  ;;  %v339_v2 = vld [vmem:[%s2000_s8 + $0xe8] sm:$0xff] }
 0x11b   : > { %607 = vmatmul.bf16.gmra.mxu1 %v352_v63  ;;  %v647_v10 = vmax.f32 %v569_v3, 0.0 }
 0x11f   : > { %v481_v4 = vpop.f32.mrf.mxu0 }
 0x120   : > { %v482_v5 = vadd.f32 %v481_v4, %v2032_v30  ;;  %v570_v6 = vpop.f32.mrf.mxu1 }
 0x121   : > { %v571_v7 = vadd.f32 %v570_v6, %v2034_v31 }
 0x122   : > { %v648_v9 = vmax.f32 %v482_v5, 0.0  ;;  %v356_v5 = vpack.c.bf16 %v339_v2, %v338_v1 }
 0x123   : > { %v649_v11 = vmax.f32 %v571_v7, 0.0 }
 0x124   : > { %v706_v14 = vpack.c.bf16 %v648_v9, %v646_v8 }
 0x125   : > { %v707_v15 = vpack.c.bf16 %v649_v11, %v647_v10 }
 0x126   : > { %884 = vmatmul.bf16.gmra.mxu2 %v706_v14 }
 0x127   : > { %973 = vmatmul.bf16.gmra.mxu3 %v707_v15  ;;  %v484_v17 = vpop.f32.mrf.mxu0 }
 0x128   : > { %v573_v18 = vpop.f32.mrf.mxu1  ;;  %v485_v19 = vadd.f32 %v484_v17, %v2032_v30 }
 0x129   : > { %v574_v20 = vadd.f32 %v573_v18, %v2034_v31  ;;  %v340_v18 = vld [vmem:[%s2000_s8 + $0xf0] sm:$0xff] }
 0x12a   : > { %523 = vmatmul.bf16.gmra.mxu0 %v353_v16  ;;  %v650_v25 = vmax.f32 %v485_v19, 0.0  ;;  %v341_v19 = vld [vmem:[%s2000_s8 + $0xf8] sm:$0xff] }
 0x12b   : > { %612 = vmatmul.bf16.gmra.mxu1 %v353_v16  ;;  %v651_v27 = vmax.f32 %v574_v20, 0.0 }
 0x12f   : > { %v486_v21 = vpop.f32.mrf.mxu0 }
 0x130   : > { %v487_v22 = vadd.f32 %v486_v21, %v2032_v30  ;;  %v575_v23 = vpop.f32.mrf.mxu1 }
 0x131   : > { %v576_v24 = vadd.f32 %v575_v23, %v2034_v31 }
 0x132   : > { %v652_v26 = vmax.f32 %v487_v22, 0.0  ;;  %v357_v22 = vpack.c.bf16 %v341_v19, %v340_v18 }
 0x133   : > { %v653_v28 = vmax.f32 %v576_v24, 0.0 }
 0x134   : > { %v708_v33 = vpack.c.bf16 %v652_v26, %v650_v25 }
 0x135   : > { %v709_v34 = vpack.c.bf16 %v653_v28, %v651_v27 }
 0x136   : > { %889 = vmatmul.bf16.gmra.mxu2 %v708_v33 }
 0x137   : > { %978 = vmatmul.bf16.gmra.mxu3 %v709_v34  ;;  %v489_v36 = vpop.f32.mrf.mxu0 }
 0x138   : > { %v578_v37 = vpop.f32.mrf.mxu1  ;;  %v490_v38 = vadd.f32 %v489_v36, %v2032_v30 }
 0x139   : > { %v579_v39 = vadd.f32 %v578_v37, %v2034_v31 }
 0x13a   : > { %528 = vmatmul.bf16.gmra.mxu0 %v354_v35  ;;  %v654_v44 = vmax.f32 %v490_v38, 0.0 }
 0x13b   : > { %617 = vmatmul.bf16.gmra.mxu1 %v354_v35  ;;  %v655_v46 = vmax.f32 %v579_v39, 0.0 }
 0x13f   : > { %v491_v40 = vpop.f32.mrf.mxu0 }
 0x140   : > { %v492_v41 = vadd.f32 %v491_v40, %v2032_v30  ;;  %v580_v42 = vpop.f32.mrf.mxu1 }
 0x141   : > { %v581_v43 = vadd.f32 %v580_v42, %v2034_v31 }
 0x142   : > { %v656_v45 = vmax.f32 %v492_v41, 0.0 }
 0x143   : > { %v657_v47 = vmax.f32 %v581_v43, 0.0 }
 0x144   : > { %v710_v50 = vpack.c.bf16 %v656_v45, %v654_v44 }
 0x145   : > { %v711_v51 = vpack.c.bf16 %v657_v47, %v655_v46 }
 0x146   : > { %894 = vmatmul.bf16.gmra.mxu2 %v710_v50 }
 0x147   : > { %983 = vmatmul.bf16.gmra.mxu3 %v711_v51  ;;  %v494_v53 = vpop.f32.mrf.mxu0 }
 0x148   : > { %v583_v54 = vpop.f32.mrf.mxu1  ;;  %v495_v55 = vadd.f32 %v494_v53, %v2032_v30 }
 0x149   : > { %v584_v56 = vadd.f32 %v583_v54, %v2034_v31 }
 0x14a   : > { %533 = vmatmul.bf16.gmra.mxu0 %v355_v52  ;;  %v658_v61 = vmax.f32 %v495_v55, 0.0 }
 0x14b   : > { %622 = vmatmul.bf16.gmra.mxu1 %v355_v52  ;;  %v659_v63 = vmax.f32 %v584_v56, 0.0 }
 0x14f   : > { %v496_v57 = vpop.f32.mrf.mxu0 }
 0x150   : > { %v497_v58 = vadd.f32 %v496_v57, %v2032_v30  ;;  %v585_v59 = vpop.f32.mrf.mxu1  ;;  %v2089_v57 = vld [vmem:[%s2237_s4] ss:$0 sm:$0xff] }
 0x151   : > { %v586_v60 = vadd.f32 %v585_v59, %v2034_v31 }
 0x152   : > { %v660_v62 = vmax.f32 %v497_v58, 0.0 }
 0x153   : > { %v661_v0 = vmax.f32 %v586_v60, 0.0 }
 0x154   : > { %v712_v3 = vpack.c.bf16 %v660_v62, %v658_v61 }
 0x155   : > { %v713_v4 = vpack.c.bf16 %v661_v0, %v659_v63 }
 0x156   : > { %899 = vmatmul.bf16.gmra.mxu2 %v712_v3 }
 0x157   : > { %988 = vmatmul.bf16.gmra.mxu3 %v713_v4  ;;  %v499_v6 = vpop.f32.mrf.mxu0 }
 0x158   : > { %v588_v7 = vpop.f32.mrf.mxu1  ;;  %v500_v8 = vadd.f32 %v499_v6, %v2032_v30 }
 0x159   : > { %v589_v9 = vadd.f32 %v588_v7, %v2034_v31 }
 0x15a   : > { %538 = vmatmul.bf16.gmra.mxu0 %v356_v5  ;;  %v662_v14 = vmax.f32 %v500_v8, 0.0 }
 0x15b   : > { %627 = vmatmul.bf16.gmra.mxu1 %v356_v5  ;;  %v663_v16 = vmax.f32 %v589_v9, 0.0 }
 0x15f   : > { %v501_v10 = vpop.f32.mrf.mxu0 }
 0x160   : > { %v502_v11 = vadd.f32 %v501_v10, %v2032_v30  ;;  %v590_v12 = vpop.f32.mrf.mxu1 }
 0x161   : > { %v591_v13 = vadd.f32 %v590_v12, %v2034_v31 }
 0x162   : > { %v664_v15 = vmax.f32 %v502_v11, 0.0 }
 0x163   : > { %v665_v17 = vmax.f32 %v591_v13, 0.0 }
 0x164   : > { %v714_v20 = vpack.c.bf16 %v664_v15, %v662_v14 }
 0x165   : > { %v715_v21 = vpack.c.bf16 %v665_v17, %v663_v16 }
 0x166   : > { %904 = vmatmul.bf16.gmra.mxu2 %v714_v20 }
 0x167   : > { %993 = vmatmul.bf16.gmra.mxu3 %v715_v21  ;;  %v504_v23 = vpop.f32.mrf.mxu0 }
 0x168   : > { %v593_v24 = vpop.f32.mrf.mxu1  ;;  %v505_v25 = vadd.f32 %v504_v23, %v2032_v30 }
 0x169   : > { %v594_v26 = vadd.f32 %v593_v24, %v2034_v31 }
 0x16a   : > { %543 = vmatmul.bf16.gmra.mxu0 %v357_v22  ;;  %v666_v33 = vmax.f32 %v505_v25, 0.0 }
 0x16b   : > { %632 = vmatmul.bf16.gmra.mxu1 %v357_v22  ;;  %v667_v35 = vmax.f32 %v594_v26, 0.0 }
 0x16f   : > { %v506_v27 = vpop.f32.mrf.mxu0 }
 0x170   : > { %v507_v28 = vadd.f32 %v506_v27, %v2032_v30  ;;  %v595_v29 = vpop.f32.mrf.mxu1 }
 0x171   : > { %v596_v32 = vadd.f32 %v595_v29, %v2034_v31 }
 0x172   : > { %v668_v34 = vmax.f32 %v507_v28, 0.0 }
 0x173   : > { %v669_v36 = vmax.f32 %v596_v32, 0.0 }
 0x174   : > { %v716_v37 = vpack.c.bf16 %v668_v34, %v666_v33 }
 0x175   : > { %v717_v38 = vpack.c.bf16 %v669_v36, %v667_v35 }
 0x176   : > { %909 = vmatmul.bf16.gmra.mxu2 %v716_v37 }
 0x177   : > { %998 = vmatmul.bf16.gmra.mxu3 %v717_v38  ;;  %v509_v39 = vpop.f32.mrf.mxu0 }
 0x178   : > { %v598_v40 = vpop.f32.mrf.mxu1  ;;  %v510_v41 = vadd.f32 %v509_v39, %v2032_v30 }
 0x179   : > { %v599_v42 = vadd.f32 %v598_v40, %v2034_v31 }
 0x17a   : > { %v670_v47 = vmax.f32 %v510_v41, 0.0 }
 0x17b   : > { %v671_v49 = vmax.f32 %v599_v42, 0.0 }
 0x17f   : > { %v511_v43 = vpop.f32.mrf.mxu0 }
 0x180   : > { %v512_v44 = vadd.f32 %v511_v43, %v2032_v30  ;;  %v600_v45 = vpop.f32.mrf.mxu1 }
 0x181   : > { %v601_v46 = vadd.f32 %v600_v45, %v2034_v31 }
 0x182   : > { %v672_v48 = vmax.f32 %v512_v44, 0.0 }
 0x183   : > { %v673_v50 = vmax.f32 %v601_v46, 0.0 }
 0x184   : > { %v718_v51 = vpack.c.bf16 %v672_v48, %v670_v47 }
 0x185   : > { %v719_v52 = vpack.c.bf16 %v673_v50, %v671_v49 }
 0x186   : > { %914 = vmatmul.bf16.gmra.mxu2 %v718_v51 }
 0x187   : > { %1003 = vmatmul.bf16.gmra.mxu3 %v719_v52  ;;  %v514_v53 = vpop.f32.mrf.mxu0 }
 0x188   : > { %v603_v54 = vpop.f32.mrf.mxu1  ;;  %v515_v58 = vadd.f32 %v514_v53, %v2032_v30 }
 0x189   : > { %v875_v55 = vpop.f32.mrf.mxu2  ;;  %v604_v59 = vadd.f32 %v603_v54, %v2034_v31 }
 0x18a   : > { %v964_v56 = vpop.f32.mrf.mxu3  ;;  %v876_v61 = vadd.f32 %v2089_v57, %v875_v55  ;;  %v674_v2 = vmax.f32 %v515_v58, 0.0 }
 0x18b   : > { %v675_v6 = vmax.f32 %v604_v59, 0.0 }
 0x18c   : > { %v965_v8 = vadd.f32 %v964_v56, %v876_v61 }
 0x18f   : > { %v516_v60 = vpop.f32.mrf.mxu0 }
 0x190   : > { %v517_v62 = vadd.f32 %v516_v60, %v2032_v30  ;;  %v605_v63 = vpop.f32.mrf.mxu1 }
 0x191   : > { %v606_v0 = vadd.f32 %v605_v63, %v2034_v31  ;;  %v877_v1 = vpop.f32.mrf.mxu2 }
 0x192   : > { %v676_v3 = vmax.f32 %v517_v62, 0.0  ;;  %v878_v4 = vadd.f32 %v2089_v57, %v877_v1  ;;  %v966_v5 = vpop.f32.mrf.mxu3 }
 0x193   : > { %v677_v7 = vmax.f32 %v606_v0, 0.0 }
 0x194   : > { %v967_v9 = vadd.f32 %v966_v5, %v878_v4  ;;  %v720_v10 = vpack.c.bf16 %v676_v3, %v674_v2 }
 0x195   : > { %v721_v11 = vpack.c.bf16 %v677_v7, %v675_v6 }
 0x196   : > { %v1426_v12 = vpack.c.bf16 %v967_v9, %v965_v8  ;;  %919 = vmatmul.bf16.gmra.mxu2 %v720_v10 }
 0x197   : > { %1008 = vmatmul.bf16.gmra.mxu3 %v721_v11  ;;  %v519_v13 = vpop.f32.mrf.mxu0 }
 0x198   : > { %1427 = vst [vmem:[%s2098_s23] sm:$0xff] %v1426_v12   ;;  %v608_v14 = vpop.f32.mrf.mxu1  ;;  %v520_v17 = vadd.f32 %v519_v13, %v2032_v30 }
 0x199   : > { %v880_v15 = vpop.f32.mrf.mxu2  ;;  %v609_v18 = vadd.f32 %v608_v14, %v2034_v31 }
 0x19a   : > { %v969_v16 = vpop.f32.mrf.mxu3  ;;  %v881_v20 = vadd.f32 %v2089_v57, %v880_v15  ;;  %v678_v25 = vmax.f32 %v520_v17, 0.0 }
 0x19b   : > { %v679_v29 = vmax.f32 %v609_v18, 0.0 }
 0x19c   : > { %v970_v33 = vadd.f32 %v969_v16, %v881_v20 }
 0x19f   : > { %v521_v19 = vpop.f32.mrf.mxu0 }
 0x1a0   : > { %v522_v21 = vadd.f32 %v521_v19, %v2032_v30  ;;  %v610_v22 = vpop.f32.mrf.mxu1 }
 0x1a1   : > { %v611_v23 = vadd.f32 %v610_v22, %v2034_v31  ;;  %v882_v24 = vpop.f32.mrf.mxu2 }
 0x1a2   : > { %v680_v26 = vmax.f32 %v522_v21, 0.0  ;;  %v883_v27 = vadd.f32 %v2089_v57, %v882_v24  ;;  %v971_v28 = vpop.f32.mrf.mxu3 }
 0x1a3   : > { %v681_v32 = vmax.f32 %v611_v23, 0.0 }
 0x1a4   : > { %v972_v34 = vadd.f32 %v971_v28, %v883_v27  ;;  %v722_v35 = vpack.c.bf16 %v680_v26, %v678_v25 }
 0x1a5   : > { %v723_v36 = vpack.c.bf16 %v681_v32, %v679_v29 }
 0x1a6   : > { %v1431_v37 = vpack.c.bf16 %v972_v34, %v970_v33  ;;  %924 = vmatmul.bf16.gmra.mxu2 %v722_v35 }
 0x1a7   : > { %1013 = vmatmul.bf16.gmra.mxu3 %v723_v36  ;;  %v524_v38 = vpop.f32.mrf.mxu0 }
 0x1a8   : > { %1503 = vst [vmem:[%s2098_s23 + $0x8] sm:$0xff] %v1431_v37   ;;  %v613_v39 = vpop.f32.mrf.mxu1  ;;  %v525_v42 = vadd.f32 %v524_v38, %v2032_v30 }
 0x1a9   : > { %v885_v40 = vpop.f32.mrf.mxu2  ;;  %v614_v43 = vadd.f32 %v613_v39, %v2034_v31 }
 0x1aa   : > { %v974_v41 = vpop.f32.mrf.mxu3  ;;  %v886_v45 = vadd.f32 %v2089_v57, %v885_v40  ;;  %v682_v50 = vmax.f32 %v525_v42, 0.0 }
 0x1ab   : > { %v683_v54 = vmax.f32 %v614_v43, 0.0 }
 0x1ac   : > { %v975_v56 = vadd.f32 %v974_v41, %v886_v45 }
 0x1af   : > { %v526_v44 = vpop.f32.mrf.mxu0 }
 0x1b0   : > { %v527_v46 = vadd.f32 %v526_v44, %v2032_v30  ;;  %v615_v47 = vpop.f32.mrf.mxu1 }
 0x1b1   : > { %v616_v48 = vadd.f32 %v615_v47, %v2034_v31  ;;  %v887_v49 = vpop.f32.mrf.mxu2 }
 0x1b2   : > { %v684_v51 = vmax.f32 %v527_v46, 0.0  ;;  %v888_v52 = vadd.f32 %v2089_v57, %v887_v49  ;;  %v976_v53 = vpop.f32.mrf.mxu3 }
 0x1b3   : > { %v685_v55 = vmax.f32 %v616_v48, 0.0 }
 0x1b4   : > { %v977_v58 = vadd.f32 %v976_v53, %v888_v52  ;;  %v724_v59 = vpack.c.bf16 %v684_v51, %v682_v50 }
 0x1b5   : > { %v725_v60 = vpack.c.bf16 %v685_v55, %v683_v54 }
 0x1b6   : > { %v1436_v61 = vpack.c.bf16 %v977_v58, %v975_v56  ;;  %929 = vmatmul.bf16.gmra.mxu2 %v724_v59 }
 0x1b7   : > { %1018 = vmatmul.bf16.gmra.mxu3 %v725_v60  ;;  %v529_v62 = vpop.f32.mrf.mxu0 }
 0x1b8   : > { %1504 = vst [vmem:[%s2098_s23 + $0x10] sm:$0xff] %v1436_v61   ;;  %v618_v63 = vpop.f32.mrf.mxu1  ;;  %v530_v2 = vadd.f32 %v529_v62, %v2032_v30 }
 0x1b9   : > { %v890_v0 = vpop.f32.mrf.mxu2  ;;  %v619_v3 = vadd.f32 %v618_v63, %v2034_v31 }
 0x1ba   : > { %v979_v1 = vpop.f32.mrf.mxu3  ;;  %v891_v5 = vadd.f32 %v2089_v57, %v890_v0  ;;  %v686_v10 = vmax.f32 %v530_v2, 0.0 }
 0x1bb   : > { %v687_v14 = vmax.f32 %v619_v3, 0.0 }
 0x1bc   : > { %v980_v16 = vadd.f32 %v979_v1, %v891_v5 }
 0x1bf   : > { %v531_v4 = vpop.f32.mrf.mxu0 }
 0x1c0   : > { %v532_v6 = vadd.f32 %v531_v4, %v2032_v30  ;;  %v620_v7 = vpop.f32.mrf.mxu1 }
 0x1c1   : > { %v621_v8 = vadd.f32 %v620_v7, %v2034_v31  ;;  %v892_v9 = vpop.f32.mrf.mxu2 }
 0x1c2   : > { %v688_v11 = vmax.f32 %v532_v6, 0.0  ;;  %v893_v12 = vadd.f32 %v2089_v57, %v892_v9  ;;  %v981_v13 = vpop.f32.mrf.mxu3 }
 0x1c3   : > { %v689_v15 = vmax.f32 %v621_v8, 0.0 }
 0x1c4   : > { %v726_v17 = vpack.c.bf16 %v688_v11, %v686_v10  ;;  %v982_v18 = vadd.f32 %v981_v13, %v893_v12 }
 0x1c5   : > { %v727_v19 = vpack.c.bf16 %v689_v15, %v687_v14 }
 0x1c6   : > { %v1441_v20 = vpack.c.bf16 %v982_v18, %v980_v16  ;;  %934 = vmatmul.bf16.gmra.mxu2 %v726_v17 }
 0x1c7   : > { %1023 = vmatmul.bf16.gmra.mxu3 %v727_v19  ;;  %v534_v21 = vpop.f32.mrf.mxu0 }
 0x1c8   : > { %1505 = vst [vmem:[%s2098_s23 + $0x18] sm:$0xff] %v1441_v20   ;;  %v623_v22 = vpop.f32.mrf.mxu1  ;;  %v535_v25 = vadd.f32 %v534_v21, %v2032_v30 }
 0x1c9   : > { %v895_v23 = vpop.f32.mrf.mxu2  ;;  %v624_v26 = vadd.f32 %v623_v22, %v2034_v31 }
 0x1ca   : > { %v984_v24 = vpop.f32.mrf.mxu3  ;;  %v896_v28 = vadd.f32 %v2089_v57, %v895_v23  ;;  %v690_v35 = vmax.f32 %v535_v25, 0.0 }
 0x1cb   : > { %v691_v39 = vmax.f32 %v624_v26, 0.0 }
 0x1cc   : > { %v985_v41 = vadd.f32 %v984_v24, %v896_v28 }
 0x1cf   : > { %v536_v27 = vpop.f32.mrf.mxu0 }
 0x1d0   : > { %v537_v29 = vadd.f32 %v536_v27, %v2032_v30  ;;  %v625_v32 = vpop.f32.mrf.mxu1 }
 0x1d1   : > { %v626_v33 = vadd.f32 %v625_v32, %v2034_v31  ;;  %v897_v34 = vpop.f32.mrf.mxu2 }
 0x1d2   : > { %v692_v36 = vmax.f32 %v537_v29, 0.0  ;;  %v898_v37 = vadd.f32 %v2089_v57, %v897_v34  ;;  %v986_v38 = vpop.f32.mrf.mxu3 }
 0x1d3   : > { %v693_v40 = vmax.f32 %v626_v33, 0.0 }
 0x1d4   : > { %v728_v42 = vpack.c.bf16 %v692_v36, %v690_v35  ;;  %v987_v43 = vadd.f32 %v986_v38, %v898_v37 }
 0x1d5   : > { %v729_v44 = vpack.c.bf16 %v693_v40, %v691_v39 }
 0x1d6   : > { %v1446_v45 = vpack.c.bf16 %v987_v43, %v985_v41  ;;  %939 = vmatmul.bf16.gmra.mxu2 %v728_v42 }
 0x1d7   : > { %1028 = vmatmul.bf16.gmra.mxu3 %v729_v44  ;;  %v539_v46 = vpop.f32.mrf.mxu0 }
 0x1d8   : > { %1506 = vst [vmem:[%s2098_s23 + $0x20] sm:$0xff] %v1446_v45   ;;  %v628_v47 = vpop.f32.mrf.mxu1  ;;  %v540_v50 = vadd.f32 %v539_v46, %v2032_v30 }
 0x1d9   : > { %v900_v48 = vpop.f32.mrf.mxu2  ;;  %v629_v51 = vadd.f32 %v628_v47, %v2034_v31 }
 0x1da   : > { %v989_v49 = vpop.f32.mrf.mxu3  ;;  %v901_v53 = vadd.f32 %v2089_v57, %v900_v48  ;;  %v694_v59 = vmax.f32 %v540_v50, 0.0 }
 0x1db   : > { %v695_v63 = vmax.f32 %v629_v51, 0.0 }
 0x1dc   : > { %v990_v1 = vadd.f32 %v989_v49, %v901_v53 }
 0x1df   : > { %v541_v52 = vpop.f32.mrf.mxu0 }
 0x1e0   : > { %v542_v54 = vadd.f32 %v541_v52, %v2032_v30  ;;  %v630_v55 = vpop.f32.mrf.mxu1 }
 0x1e1   : > { %v631_v56 = vadd.f32 %v630_v55, %v2034_v31  ;;  %v902_v58 = vpop.f32.mrf.mxu2 }
 0x1e2   : > { %v696_v60 = vmax.f32 %v542_v54, 0.0  ;;  %v903_v61 = vadd.f32 %v2089_v57, %v902_v58  ;;  %v991_v62 = vpop.f32.mrf.mxu3 }
 0x1e3   : > { %v697_v0 = vmax.f32 %v631_v56, 0.0 }
 0x1e4   : > { %v730_v2 = vpack.c.bf16 %v696_v60, %v694_v59  ;;  %v992_v3 = vadd.f32 %v991_v62, %v903_v61 }
 0x1e5   : > { %v731_v4 = vpack.c.bf16 %v697_v0, %v695_v63 }
 0x1e6   : > { %v1451_v5 = vpack.c.bf16 %v992_v3, %v990_v1  ;;  %944 = vmatmul.bf16.gmra.mxu2 %v730_v2 }
 0x1e7   : > { %1033 = vmatmul.bf16.gmra.mxu3 %v731_v4  ;;  %v544_v6 = vpop.f32.mrf.mxu0 }
 0x1e8   : > { %1507 = vst [vmem:[%s2098_s23 + $0x28] sm:$0xff] %v1451_v5   ;;  %v633_v7 = vpop.f32.mrf.mxu1  ;;  %v545_v10 = vadd.f32 %v544_v6, %v2032_v30 }
 0x1e9   : > { %v905_v8 = vpop.f32.mrf.mxu2  ;;  %v634_v11 = vadd.f32 %v633_v7, %v2034_v31 }
 0x1ea   : > { %v994_v9 = vpop.f32.mrf.mxu3  ;;  %v906_v13 = vadd.f32 %v2089_v57, %v905_v8  ;;  %v698_v18 = vmax.f32 %v545_v10, 0.0 }
 0x1eb   : > { %v699_v22 = vmax.f32 %v634_v11, 0.0 }
 0x1ec   : > { %v995_v24 = vadd.f32 %v994_v9, %v906_v13 }
 0x1ef   : > { %v546_v12 = vpop.f32.mrf.mxu0 }
 0x1f0   : > { %v547_v14 = vadd.f32 %v546_v12, %v2032_v30  ;;  %v635_v15 = vpop.f32.mrf.mxu1 }
 0x1f1   : > { %v636_v16 = vadd.f32 %v635_v15, %v2034_v31  ;;  %v907_v17 = vpop.f32.mrf.mxu2 }
 0x1f2   : > { %v700_v19 = vmax.f32 %v547_v14, 0.0  ;;  %v908_v20 = vadd.f32 %v2089_v57, %v907_v17  ;;  %v996_v21 = vpop.f32.mrf.mxu3 }
 0x1f3   : > { %v701_v23 = vmax.f32 %v636_v16, 0.0 }
 0x1f4   : > { %v732_v25 = vpack.c.bf16 %v700_v19, %v698_v18  ;;  %v997_v26 = vadd.f32 %v996_v21, %v908_v20 }
 0x1f5   : > { %v733_v27 = vpack.c.bf16 %v701_v23, %v699_v22 }
 0x1f6   : > { %v1456_v28 = vpack.c.bf16 %v997_v26, %v995_v24  ;;  %949 = vmatmul.bf16.gmra.mxu2 %v732_v25 }
 0x1f7   : > { %1038 = vmatmul.bf16.gmra.mxu3 %v733_v27 }
 0x1f8   : > { %1508 = vst [vmem:[%s2098_s23 + $0x30] sm:$0xff] %v1456_v28  }
 0x1f9   : > { %v910_v30 = vpop.f32.mrf.mxu2 }
 0x1fa   : > { %v999_v29 = vpop.f32.mrf.mxu3  ;;  %v911_v31 = vadd.f32 %v2089_v57, %v910_v30 }
 0x1fc   : > { %v1000_v35 = vadd.f32 %v999_v29, %v911_v31 }
 0x201   : > { %v912_v32 = vpop.f32.mrf.mxu2 }
 0x202   : > { %v913_v33 = vadd.f32 %v2089_v57, %v912_v32  ;;  %v1001_v34 = vpop.f32.mrf.mxu3 }
 0x204   : > { %v1002_v36 = vadd.f32 %v1001_v34, %v913_v33 }
 0x206   : > { %v1461_v37 = vpack.c.bf16 %v1002_v36, %v1000_v35 }
 0x208   : > { %1509 = vst [vmem:[%s2098_s23 + $0x38] sm:$0xff] %v1461_v37  }
 0x209   : > { %v915_v38 = vpop.f32.mrf.mxu2 }
 0x20a   : > { %v1004_v39 = vpop.f32.mrf.mxu3  ;;  %v916_v40 = vadd.f32 %v2089_v57, %v915_v38 }
 0x20c   : > { %v1005_v44 = vadd.f32 %v1004_v39, %v916_v40 }
 0x211   : > { %v917_v41 = vpop.f32.mrf.mxu2 }
 0x212   : > { %v918_v42 = vadd.f32 %v2089_v57, %v917_v41  ;;  %v1006_v43 = vpop.f32.mrf.mxu3 }
 0x214   : > { %v1007_v45 = vadd.f32 %v1006_v43, %v918_v42 }
 0x216   : > { %v1466_v46 = vpack.c.bf16 %v1007_v45, %v1005_v44 }
 0x218   : > { %1510 = vst [vmem:[%s2098_s23 + $0x40] sm:$0xff] %v1466_v46  }
 0x219   : > { %v920_v47 = vpop.f32.mrf.mxu2 }
 0x21a   : > { %v1009_v48 = vpop.f32.mrf.mxu3  ;;  %v921_v49 = vadd.f32 %v2089_v57, %v920_v47 }
 0x21c   : > { %v1010_v53 = vadd.f32 %v1009_v48, %v921_v49 }
 0x221   : > { %v922_v50 = vpop.f32.mrf.mxu2 }
 0x222   : > { %v923_v51 = vadd.f32 %v2089_v57, %v922_v50  ;;  %v1011_v52 = vpop.f32.mrf.mxu3 }
 0x224   : > { %v1012_v54 = vadd.f32 %v1011_v52, %v923_v51 }
 0x226   : > { %v1471_v55 = vpack.c.bf16 %v1012_v54, %v1010_v53 }
 0x228   : > { %1511 = vst [vmem:[%s2098_s23 + $0x48] sm:$0xff] %v1471_v55  }
 0x229   : > { %v925_v56 = vpop.f32.mrf.mxu2 }
 0x22a   : > { %v1014_v58 = vpop.f32.mrf.mxu3  ;;  %v926_v59 = vadd.f32 %v2089_v57, %v925_v56 }
 0x22c   : > { %v1015_v63 = vadd.f32 %v1014_v58, %v926_v59 }
 0x231   : > { %v927_v60 = vpop.f32.mrf.mxu2 }
 0x232   : > { %v928_v61 = vadd.f32 %v2089_v57, %v927_v60  ;;  %v1016_v62 = vpop.f32.mrf.mxu3 }
 0x234   : > { %v1017_v0 = vadd.f32 %v1016_v62, %v928_v61 }
 0x236   : > { %v1476_v1 = vpack.c.bf16 %v1017_v0, %v1015_v63 }
 0x238   : > { %1512 = vst [vmem:[%s2098_s23 + $0x50] sm:$0xff] %v1476_v1  }
 0x239   : > { %v930_v2 = vpop.f32.mrf.mxu2 }
 0x23a   : > { %v1019_v3 = vpop.f32.mrf.mxu3  ;;  %v931_v4 = vadd.f32 %v2089_v57, %v930_v2 }
 0x23c   : > { %v1020_v8 = vadd.f32 %v1019_v3, %v931_v4 }
 0x241   : > { %v932_v5 = vpop.f32.mrf.mxu2 }
 0x242   : > { %v933_v6 = vadd.f32 %v2089_v57, %v932_v5  ;;  %v1021_v7 = vpop.f32.mrf.mxu3 }
 0x244   : > { %v1022_v9 = vadd.f32 %v1021_v7, %v933_v6 }
 0x246   : > { %v1481_v10 = vpack.c.bf16 %v1022_v9, %v1020_v8 }
 0x248   : > { %1513 = vst [vmem:[%s2098_s23 + $0x58] sm:$0xff] %v1481_v10  }
 0x249   : > { %v935_v11 = vpop.f32.mrf.mxu2 }
 0x24a   : > { %v1024_v12 = vpop.f32.mrf.mxu3  ;;  %v936_v13 = vadd.f32 %v2089_v57, %v935_v11 }
 0x24c   : > { %v1025_v17 = vadd.f32 %v1024_v12, %v936_v13 }
 0x251   : > { %v937_v14 = vpop.f32.mrf.mxu2 }
 0x252   : > { %v938_v15 = vadd.f32 %v2089_v57, %v937_v14  ;;  %v1026_v16 = vpop.f32.mrf.mxu3 }
 0x254   : > { %v1027_v18 = vadd.f32 %v1026_v16, %v938_v15 }
 0x256   : > { %v1486_v19 = vpack.c.bf16 %v1027_v18, %v1025_v17 }
 0x258   : > { %1514 = vst [vmem:[%s2098_s23 + $0x60] sm:$0xff] %v1486_v19  }
 0x259   : > { %v940_v20 = vpop.f32.mrf.mxu2 }
 0x25a   : > { %v1029_v21 = vpop.f32.mrf.mxu3  ;;  %v941_v22 = vadd.f32 %v2089_v57, %v940_v20 }
 0x25c   : > { %v1030_v26 = vadd.f32 %v1029_v21, %v941_v22 }
 0x261   : > { %v942_v23 = vpop.f32.mrf.mxu2 }
 0x262   : > { %v943_v24 = vadd.f32 %v2089_v57, %v942_v23  ;;  %v1031_v25 = vpop.f32.mrf.mxu3 }
 0x264   : > { %v1032_v27 = vadd.f32 %v1031_v25, %v943_v24 }
 0x266   : > { %v1491_v28 = vpack.c.bf16 %v1032_v27, %v1030_v26 }
 0x268   : > { %1515 = vst [vmem:[%s2098_s23 + $0x68] sm:$0xff] %v1491_v28  }
 0x269   : > { %v945_v30 = vpop.f32.mrf.mxu2 }
 0x26a   : > { %v1034_v29 = vpop.f32.mrf.mxu3  ;;  %v946_v31 = vadd.f32 %v2089_v57, %v945_v30 }
 0x26c   : > { %v1035_v35 = vadd.f32 %v1034_v29, %v946_v31 }
 0x271   : > { %v947_v32 = vpop.f32.mrf.mxu2 }
 0x272   : > { %v948_v33 = vadd.f32 %v2089_v57, %v947_v32  ;;  %v1036_v34 = vpop.f32.mrf.mxu3 }
 0x274   : > { %v1037_v36 = vadd.f32 %v1036_v34, %v948_v33 }
 0x276   : > { %v1496_v37 = vpack.c.bf16 %v1037_v36, %v1035_v35 }
 0x278   : > { %1516 = vst [vmem:[%s2098_s23 + $0x70] sm:$0xff] %v1496_v37  }
 0x279   : > { %v950_v38 = vpop.f32.mrf.mxu2 }
 0x27a   : > { %v1039_v39 = vpop.f32.mrf.mxu3  ;;  %v951_v40 = vadd.f32 %v2089_v57, %v950_v38 }
 0x27c   : > { %v1040_v44 = vadd.f32 %v1039_v39, %v951_v40 }
 0x281   : > { %v952_v41 = vpop.f32.mrf.mxu2 }
 0x282   : > { %v953_v42 = vadd.f32 %v2089_v57, %v952_v41  ;;  %v1041_v43 = vpop.f32.mrf.mxu3 }
 0x284   : > { %v1042_v45 = vadd.f32 %v1041_v43, %v953_v42  ;;  %1115 = sbr.rel (!%p1908_p11) target bundleno = 680 (0x2a8), region = 60 }
 0x286   : > { %v1501_v46 = vpack.c.bf16 %v1042_v45, %v1040_v44 }
 0x288   : > { %1517 = vst [vmem:[%s2098_s23 + $0x78] sm:$0xff] %v1501_v46  }
 0x289   : > { %s2266_s15 = smov (!%p1118_p6, %s1117_s15), 32 }
 0x28a   : > { %s1382_s10 = sshll.u32 %s2266_s15, 2 }
 0x28b   : > { %s1121_s9 = ssub.s32 128, %s1382_s10 }
 0x28c   : > { %s1122_s11 = sshll.u32 %s1121_s9, 4 }
 0x28d   : > { %1123 = vsyncadd %s1109_s28, %s1122_s11  ;;  %p2179_p5 = scmp.ne.s32.totalorder %s1382_s10, 0  ;;  %s1422_s1 = sshll.u32 %s1877_s22, 7 }
 0x28e   : > { %s1126_s13 = scalar_lea.hbm %s2238_s5, %s1422_s1  ;;  %s1128_s25 = sshll.u32 %s2098_s23, 4  ;;  %s2188_s25 = int_to_ptr.vmem [resolvable:$true] %s1128_s25 }
 0x28f   : > { %s1130_s26 = sshll.u32 %s1126_s13, 4  ;;  %s1386_s8 = sshll.u32 %s2266_s15, 6  ;;  %s2190_s26 = int_to_ptr.hbm [resolvable:$true] %s1130_s26 }
 0x290   : > { %s1726_s29 = sshra.s32 %s2188_s25, 4  ;;  %s1728_s7 = sshrl.u32 %s1386_s8, 4  ;;  %s1727_s29 = int_to_ptr.vmem [resolvable:$true] %s1726_s29 }
 0x291   : > { %s1733_s17 = scalar_lea.vmem %s1727_s29, %s1728_s7  ;;  %s1823_s22 = smov [#allocation10]  }
 0x292   : > { %p1734_p11 = scmp.ne.s32.totalorder %s1727_s29, %s1733_s17  ;;  %s1737_s14 = scalar_lea.vmem %s1823_s22, 256 }
 0x293   : > { %p1739_p1 = scmp.lt.s32.totalorder %s1737_s14, %s1733_s17 }
 0x294   : > { %p1735_p9 = pnand %p1734_p11, %p2179_p5 }
 0x296   : > { %p1736_p10 = pneg %p1735_p9 }
 0x298   : > { %p1741_p0 = pnand %p1739_p1, %p1736_p10 }
 0x29a   : > { %1744 = shalt.err (!%p1741_p0)
}
 0x29b   : > { %s1745_s23 = sshra.s32 %s2190_s26, 4  ;;  %s1756_s1 = scalar_lea.hbm %s2238_s5, 152  ;;  %s1746_s23 = int_to_ptr.hbm [resolvable:$true] %s1745_s23 }
 0x29c   : > { %s1752_s10 = scalar_lea.hbm %s1746_s23, %s1728_s7  ;;  %p1757_p4 = scmp.lt.s32.totalorder %s1746_s23, %s2238_s5 }
 0x29d   : > { %p1753_p3 = scmp.ne.s32.totalorder %s1746_s23, %s1752_s10  ;;  %p1758_p12 = scmp.lt.s32.totalorder %s1756_s1, %s1752_s10 }
 0x29f   : > { %p1754_p7 = pnand %p1753_p3, %p2179_p5  ;;  %p1759_p13 = por %p1758_p12, %p1757_p4 }
 0x2a1   : > { %p1755_p8 = pneg %p1754_p7 }
 0x2a3   : > { %p1760_p2 = pnand %p1759_p13, %p1755_p8 }
 0x2a5   : > { %1763 = shalt.err (!%p1760_p2)
}
 0x2a6   : > { %s1824_s13 = smov 64   ;;  %s1825_s29 = smov 4  }
 0x2a7   : > { %1136 = dma.vmem_to_hbm [thread:$0]  (%p2179_p5), %s2188_s25, %s1386_s8, %s2190_s26, %s1109_s28, %s1824_s13, %s1824_s13, %s1825_s29  }
 0x2a8 PF: > { %s1145_s7 = sand.u32 1, %s1799_s18   ;;  %p2257_p6 = scmp.ne.s32.totalorder %s2246_s6, 0 }
 0x2a9   : > { %p2258_p11 = scmp.ge.s32.totalorder %s1811_s21, 2  ;;  %s1146_s17 = scalar_lea.sflag [#allocation4], %s1145_s7 }
 0x2ab   : > { %p1543_p9 = pnand %p2258_p11, %p2257_p6 }
 0x2ad   : > { %p1544_p10 = pneg %p1543_p9 }
 0x2af   : > { %1794 = dma.done.wait (%p1544_p10), %s1146_s17, 2048  }
 0x2b0   : > { %1796 = vsyncadd (%p1544_p10), %s1146_s17, 4294965248  ;;  %p20_p1 = scmp.ge.s32.totalorder %s1881_s24, 4   ;;  %s2259_s18 = smov %s1803_s19 }
 0x2b1   : > { %s2260_s19 = smov %s1807_s20  ;;  %s2261_s20 = smov %s1893_s27 }
 0x2b2   : > { %s2262_s21 = smov %s1881_s24  ;;  %22 = sbr.rel (!%p20_p1) target bundleno = 10 (0xa), region = 97 }
 0x2b7   :  { %1152 = vsyncpa [#allocation3], 1 }
 0x2b8   :  { %1154 = vsyncpa [#allocation3 + $0x1], 1 }
 0x2b9   :  { %1155 = vsyncpa [#allocation6], 1 }
 0x2ba   :  { %1156 = vsyncpa [#allocation9], 1 }
 0x2bb   :  { %1157 = vsyncpa [#allocation4], 1 }
 0x2bc   :  { %1159 = vsyncpa [#allocation4 + $0x1], 1 }

</bundles_post_ra>
